<compile_context>
chip_gen: v7x
topology: tpu7x:2x2x1
jax: 0.10.0
libtpu: 0.0.40
codegen_flags: <defaults>
</compile_context>

<pallas_src>
import jax
import jax.numpy as jnp
from jax import lax
from jax.experimental import pallas as pl
from jax.experimental.pallas import tpu as pltpu

# ----------------------------- config ---------------------------------------
INPUT_DIM = 16      # config.input_dim  (vocab size)
HIDDEN = 32         # config.hidden_dim
NUM_LABELS = 4      # config.num_labels
WIDTH = 3
K1, K2, K3 = WIDTH, WIDTH * 2, WIDTH * 4          # 3, 6, 12  (RF = 19)
BN_EPS = 1e-5

BATCH = 2
SEQ_LEN = 32                                      # must be >= 19
L1 = SEQ_LEN - K1 + 1                             # 30
L2 = L1 - K2 + 1                                  # 25
L_OUT = L2 - K3 + 1                               # 14

# packed weight-slab row offsets (all multiples of 16 -> bf16 tile aligned)
EW1_OFF = 0                                       # embedding folded into conv1
C2_OFF = EW1_OFF + K1 * INPUT_DIM                 # 48
C3_OFF = C2_OFF + K2 * HIDDEN                     # 240
W4_OFF = C3_OFF + K3 * HIDDEN                     # 624
W5_OFF = W4_OFF + HIDDEN                          # 656
W_ROWS = W5_OFF + HIDDEN                          # 688
B_ROWS = 8                                        # 6 bias rows + 2 pad rows

# dense packed output per batch element: (8, 128)
#   rows 0..3 : logits^T (lanes 0..13), lane 15 = collapsed
#   row  4    : softmax(att) (lanes 0..13)
OUT_SUB = 8
OUT_LANES = 128


# ----------------------------- kernel ---------------------------------------
def net_kernel(tok_ref, w_ref, b_ref, hw_ref, out_ref):
    bias = b_ref[...]                                           # (8, 32) f32, loaded once
    vocab = lax.broadcasted_iota(jnp.int32, (SEQ_LEN, INPUT_DIM), 1)

    # ---- conv1 with embedding + BN folded in: one one-hot im2col matmul -----
    p1_blocks = []
    for bb in range(BATCH):
        oh = (tok_ref[bb] == vocab).astype(jnp.float32)         # (SEQ_LEN, 16)
        p1_blocks.append(jnp.concatenate(
            [oh[i:i + L1, :] for i in range(K1)], axis=1))      # (L1, K1*16)
    p1 = jnp.concatenate(p1_blocks, axis=0)                     # (B*L1, 48)
    h = jnp.dot(p1.astype(jnp.bfloat16),
                w_ref[EW1_OFF:EW1_OFF + K1 * INPUT_DIM, :],
                preferred_element_type=jnp.float32)
    h = jnp.maximum(h + bias[0:1, :], 0.0)                      # (B*L1, H)

    # ---- conv2 / conv3: ONE im2col matmul each (BN folded, batch stacked) ----
    def conv_bn_relu(v, l_in, k, w_off, b_row):
        l_out = l_in - k + 1
        blocks = []
        for bb in range(BATCH):
            base = bb * l_in
            blocks.append(jnp.concatenate(
                [v[base + i:base + i + l_out, :] for i in range(k)], axis=1))
        p = jnp.concatenate(blocks, axis=0)                     # (B*l_out, k*H)
        y = jnp.dot(p.astype(jnp.bfloat16),
                    w_ref[w_off:w_off + k * HIDDEN, :],
                    preferred_element_type=jnp.float32)
        return jnp.maximum(y + bias[b_row:b_row + 1, :], 0.0)

    h = conv_bn_relu(h, L1, K2, C2_OFF, 1)                      # (B*L2, H)
    h = conv_bn_relu(h, L2, K3, C3_OFF, 2)                      # (B*L_OUT, H)

    # ---- the two 1x1 convs are plain dense layers ----------------------------
    def dense_relu(v, w_off, b_row):
        y = jnp.dot(v.astype(jnp.bfloat16),
                    w_ref[w_off:w_off + HIDDEN, :],
                    preferred_element_type=jnp.float32)
        return jnp.maximum(y + bias[b_row:b_row + 1, :], 0.0)

    h = dense_relu(h, W4_OFF, 3)
    h = dense_relu(h, W5_OFF, 4)                                # (B*L_OUT, H) f32

    # ---- fused prediction + attention head (f32 operands, tiny) -------------
    # head cols 0..3 = pred logits, col 4 = attention score, cols 5..31 = 0.
    head = jnp.dot(h, hw_ref[...],
                   preferred_element_type=jnp.float32) + bias[5:6, :]   # (B*L_OUT, H)

    # pad each batch segment to 16 rows -> (32, H), then one transpose.
    zpad = jnp.zeros((16 - L_OUT, HIDDEN), jnp.float32)
    head_pad = jnp.concatenate(
        [head[0:L_OUT, :], zpad, head[L_OUT:2 * L_OUT, :], zpad], axis=0)  # (32, H)
    head_t = head_pad.T                                         # (H, 32): lanes = b*16 + pos

    lane = lax.broadcasted_iota(jnp.int32, (1, 16), 1)
    for bb in range(BATCH):
        blk = head_t[:, bb * 16:(bb + 1) * 16]                  # (H, 16)
        logits_t = blk[0:NUM_LABELS, :]                         # (4, 16); lanes>=14 are 0
        att_row = blk[NUM_LABELS:NUM_LABELS + 1, :]             # (1, 16)

        # exact masked softmax over the L_OUT valid lanes
        att_m = jnp.where(lane < L_OUT, att_row, -1e30)
        m = jnp.max(att_m, axis=1, keepdims=True)
        e = jnp.exp(att_m - m)                                  # lanes>=14 -> exactly 0
        re_att = e / jnp.sum(e, axis=1, keepdims=True)

        collapsed = jnp.sum(re_att * logits_t, axis=1, keepdims=True)   # (4, 1)

        # pack one dense (8, 128) block per batch element, single full store
        rows03 = jnp.concatenate([logits_t[:, 0:15], collapsed], axis=1)  # (4, 16)
        block16 = jnp.concatenate(
            [rows03, re_att, jnp.zeros((OUT_SUB - NUM_LABELS - 1, 16), jnp.float32)],
            axis=0)                                             # (8, 16)
        block = jnp.concatenate(
            [block16, jnp.zeros((OUT_SUB, OUT_LANES - 16), jnp.float32)], axis=1)
        out_ref[bb, :, :] = block                               # (8, 128) dense write


# ----------------------------- wrapper ---------------------------------------
def pack_params(params):
    """Fold eval-mode BN into conv weights/bias, fold the embedding table into
    conv1, and pack into one bf16 weight slab (W_ROWS, H), one f32 bias slab
    (B_ROWS, H) and one f32 head-weight matrix (H, H)."""
    def fold(w, b, g, be, m, v):
        s = g * lax.rsqrt(v + BN_EPS)                 # (1, H) per out-channel
        return w * s[None], (b - m) * s + be          # (K,H,H), (1,H)

    w1f, b1f = fold(params["w1"], params["b1"], params["g1"],
                    params["be1"], params["m1"], params["v1"])
    w2f, b2f = fold(params["w2"], params["b2"], params["g2"],
                    params["be2"], params["m2"], params["v2"])
    w3f, b3f = fold(params["w3"], params["b3"], params["g3"],
                    params["be3"], params["m3"], params["v3"])

    # embedding folded into the (BN-folded) conv1 weights: (K1*16, H)
    ew1 = jnp.einsum("vc,kco->kvo", params["embedding"], w1f)
    ew1 = ew1.reshape(K1 * INPUT_DIM, HIDDEN)

    w_slab = jnp.concatenate(
        [ew1,
         w2f.reshape(K2 * HIDDEN, HIDDEN),
         w3f.reshape(K3 * HIDDEN, HIDDEN),
         params["w4"], params["w5"]], axis=0).astype(jnp.bfloat16)       # (688, 32)

    pad_cols = HIDDEN - NUM_LABELS - 1
    head_w = jnp.concatenate(
        [params["wp"], params["wa"], jnp.zeros((HIDDEN, pad_cols), jnp.float32)],
        axis=1).astype(jnp.float32)                                      # (32, 32)
    b_head = jnp.concatenate(
        [params["bp"], params["ba"], jnp.zeros((1, pad_cols), jnp.float32)], axis=1)

    bias_rows = [b1f, b2f, b3f, params["b4"], params["b5"], b_head]
    b_slab = jnp.concatenate(
        bias_rows + [jnp.zeros((B_ROWS - len(bias_rows), HIDDEN), jnp.float32)],
        axis=0).astype(jnp.float32)                                      # (8, 32)

    assert w_slab.shape == (W_ROWS, HIDDEN)
    return {"w_slab": w_slab, "b_slab": b_slab, "head_w": head_w}


def net_forward(tokens, packed):
    assert tokens.shape == (BATCH, SEQ_LEN)
    tok3 = tokens.reshape(BATCH, SEQ_LEN, 1).astype(jnp.int32)

    out = pl.pallas_call(
        net_kernel,
        out_shape=jax.ShapeDtypeStruct((BATCH, OUT_SUB, OUT_LANES), jnp.float32),
        grid_spec=pltpu.PrefetchScalarGridSpec(
            num_scalar_prefetch=0,
            grid=(1,),                                     # single fused step, batched in M
            in_specs=[
                pl.BlockSpec((BATCH, SEQ_LEN, 1), lambda i: (0, 0, 0)),   # tokens
                pl.BlockSpec((W_ROWS, HIDDEN), lambda i: (0, 0)),         # weight slab
                pl.BlockSpec((B_ROWS, HIDDEN), lambda i: (0, 0)),         # bias slab
                pl.BlockSpec((HIDDEN, HIDDEN), lambda i: (0, 0)),         # head weights
            ],
            out_specs=pl.BlockSpec((BATCH, OUT_SUB, OUT_LANES), lambda i: (0, 0, 0)),
        ),
        compiler_params=pltpu.CompilerParams(
            dimension_semantics=("arbitrary",)),
    )(tok3, packed["w_slab"], packed["b_slab"], packed["head_w"])

    logits = out[:, 0:NUM_LABELS, 0:L_OUT]            # (B, NUM_LABELS, L_OUT)
    att = out[:, NUM_LABELS, 0:L_OUT]                 # (B, L_OUT)
    collapsed = out[:, 0:NUM_LABELS, 15]              # (B, NUM_LABELS)
    return collapsed, att, logits


# ----------------------------- reference -------------------------------------
def net_reference(tokens, params):
    emb = jnp.take(params["embedding"], tokens, axis=0)  # (B, L, H)

    def conv(h, w, b, k):
        l_out = h.shape[1] - k + 1
        acc = jnp.zeros((h.shape[0], l_out, w.shape[-1]), jnp.float32)
        for i in range(k):
            acc = acc + jnp.einsum("blh,hg->blg", h[:, i:i + l_out, :], w[i])
        return acc + b

    def bn(h, g, be, m, v):
        return (h - m) * lax.rsqrt(v + BN_EPS) * g + be

    p = params
    h = jnp.maximum(bn(conv(emb, p["w1"], p["b1"], K1), p["g1"], p["be1"], p["m1"], p["v1"]), 0.0)
    h = jnp.maximum(bn(conv(h, p["w2"], p["b2"], K2), p["g2"], p["be2"], p["m2"], p["v2"]), 0.0)
    h = jnp.maximum(bn(conv(h, p["w3"], p["b3"], K3), p["g3"], p["be3"], p["m3"], p["v3"]), 0.0)
    h = jnp.maximum(jnp.einsum("blh,hg->blg", h, p["w4"]) + p["b4"], 0.0)
    h = jnp.maximum(jnp.einsum("blh,hg->blg", h, p["w5"]) + p["b5"], 0.0)
    logits = jnp.einsum("blh,hn->bln", h, p["wp"]) + p["bp"]   # (B, L_out, NL)
    att = jnp.einsum("blh,ho->blo", h, p["wa"]) + p["ba"]      # (B, L_out, 1)
    re_att = jax.nn.softmax(att, axis=1)
    collapsed = jnp.sum(re_att * logits, axis=1)
    return collapsed, re_att[:, :, 0], jnp.transpose(logits, (0, 2, 1))


# ----------------------------- params ----------------------------------------
def init_params(key):
    ks = jax.random.split(key, 32)
    it = iter(ks)

    def u(shape, scale=0.2):
        return jax.random.uniform(next(it), shape, jnp.float32, -scale, scale)

    params = {}
    emb = u((INPUT_DIM, HIDDEN), 0.5)
    params["embedding"] = emb.at[0].set(0.0)                 # padding_idx=0

    def conv_block(name, k):
        params[f"w{name}"] = u((k, HIDDEN, HIDDEN), 0.15)    # (K, C_in, C_out)
        params[f"b{name}"] = u((1, HIDDEN), 0.1)

    def bn_block(name):
        params[f"g{name}"] = 1.0 + u((1, HIDDEN), 0.1)       # gamma
        params[f"be{name}"] = u((1, HIDDEN), 0.1)            # beta
        params[f"m{name}"] = u((1, HIDDEN), 0.1)             # running_mean
        params[f"v{name}"] = 0.5 + jnp.abs(u((1, HIDDEN), 0.5))  # running_var > 0

    conv_block("1", K1); bn_block("1")
    conv_block("2", K2); bn_block("2")
    conv_block("3", K3); bn_block("3")
    params["w4"] = u((HIDDEN, HIDDEN), 0.15); params["b4"] = u((1, HIDDEN), 0.1)
    params["w5"] = u((HIDDEN, HIDDEN), 0.15); params["b5"] = u((1, HIDDEN), 0.1)
    params["wp"] = u((HIDDEN, NUM_LABELS), 0.2); params["bp"] = u((1, NUM_LABELS), 0.1)
    params["wa"] = u((HIDDEN, 1), 0.2); params["ba"] = u((1, 1), 0.1)
    return params


# ----------------------------- main -------------------------------------------
if __name__ == "__main__":
    key = jax.random.PRNGKey(0)
    k_tok, k_par = jax.random.split(key)
    tokens = jax.random.randint(k_tok, (BATCH, SEQ_LEN), 0, INPUT_DIM, dtype=jnp.int32)
    params = init_params(k_par)
    packed = pack_params(params)          # BN + embedding fold, off the hot path

    fwd = jax.jit(net_forward)
    collapsed, att, logits = fwd(tokens, packed)
    jax.block_until_ready((collapsed, att, logits))

    # sanity: shapes match the PyTorch forward
    assert collapsed.shape == (BATCH, NUM_LABELS)
    assert att.shape == (BATCH, L_OUT)
    assert logits.shape == (BATCH, NUM_LABELS, L_OUT)

    # numerical check against a pure-JAX f32 reference (kernel uses bf16
    # conv-matmul operands with f32 accumulation, hence the looser tolerance)
    ref_c, ref_a, ref_l = net_reference(tokens, params)
    assert jnp.allclose(collapsed, ref_c, rtol=1e-2, atol=1e-2)
    assert jnp.allclose(att, ref_a, rtol=1e-2, atol=1e-2)
    assert jnp.allclose(logits, ref_l, rtol=1e-2, atol=1e-2)

    print("KERNEL_OK")
</pallas_src>

<mosaic_0001>
module attributes {stable_mosaic.version = 11 : i64} {
  func.func @net_kernel(%arg0: i32, %arg1: memref<2x32x1xi32, #tpu.memory_space<vmem>>, %arg2: memref<688x32xbf16, #tpu.memory_space<vmem>>, %arg3: memref<8x32xf32, #tpu.memory_space<vmem>>, %arg4: memref<32x32xf32, #tpu.memory_space<vmem>>, %arg5: memref<2x8x128xf32, #tpu.memory_space<vmem>>) attributes {dimension_semantics = [#tpu.dimension_semantics<arbitrary>], iteration_bounds = array<i64: 1>, scalar_prefetch = 0 : i64, scratch_operands = 0 : i64, tpu.core_type = #tpu.core_type<tc>, window_params = [{pipeline_mode = #tpu.pipeline_mode<synchronous>, transform_indices = @transform_0, window_bounds = array<i64: 2, 32, 1>}, {pipeline_mode = #tpu.pipeline_mode<synchronous>, transform_indices = @transform_1, window_bounds = array<i64: 688, 32>}, {pipeline_mode = #tpu.pipeline_mode<synchronous>, transform_indices = @transform_2, window_bounds = array<i64: 8, 32>}, {pipeline_mode = #tpu.pipeline_mode<synchronous>, transform_indices = @transform_3, window_bounds = array<i64: 32, 32>}, {pipeline_mode = #tpu.pipeline_mode<synchronous>, transform_indices = @transform_4, window_bounds = array<i64: 2, 8, 128>}]} {
    %c0 = arith.constant 0 : index
    %c0_0 = arith.constant 0 : index
    %0 = vector.load %arg3[%c0, %c0_0] : memref<8x32xf32, #tpu.memory_space<vmem>>, vector<8x32xf32>
    %1 = tpu.iota {dimensions = array<i32: 1>} : vector<32x16xi32>
    %c0_1 = arith.constant 0 : index
    %c0_2 = arith.constant 0 : index
    %c0_3 = arith.constant 0 : index
    %2 = vector.load %arg1[%c0_1, %c0_2, %c0_3] : memref<2x32x1xi32, #tpu.memory_space<vmem>>, vector<1x32x1xi32>
    %3 = vector.shape_cast %2 : vector<1x32x1xi32> to vector<32x1xi32>
    %4 = vector.broadcast %3 : vector<32x1xi32> to vector<32x16xi32>
    %5 = arith.cmpi eq, %4, %1 : vector<32x16xi32>
    %6 = arith.extui %5 : vector<32x16xi1> to vector<32x16xi32>
    %7 = arith.sitofp %6 : vector<32x16xi32> to vector<32x16xf32>
    %8 = vector.extract_strided_slice %7 {offsets = [0, 0], sizes = [30, 16], strides = [1, 1]} : vector<32x16xf32> to vector<30x16xf32>
    %9 = vector.extract_strided_slice %7 {offsets = [1, 0], sizes = [30, 16], strides = [1, 1]} : vector<32x16xf32> to vector<30x16xf32>
    %10 = vector.extract_strided_slice %7 {offsets = [2, 0], sizes = [30, 16], strides = [1, 1]} : vector<32x16xf32> to vector<30x16xf32>
    %11 = tpu.concatenate %8, %9, %10 in 1 : vector<30x16xf32>, vector<30x16xf32>, vector<30x16xf32> -> vector<30x48xf32>
    %c1 = arith.constant 1 : index
    %c0_4 = arith.constant 0 : index
    %c0_5 = arith.constant 0 : index
    %12 = vector.load %arg1[%c1, %c0_4, %c0_5] : memref<2x32x1xi32, #tpu.memory_space<vmem>>, vector<1x32x1xi32>
    %13 = vector.shape_cast %12 : vector<1x32x1xi32> to vector<32x1xi32>
    %14 = vector.broadcast %13 : vector<32x1xi32> to vector<32x16xi32>
    %15 = arith.cmpi eq, %14, %1 : vector<32x16xi32>
    %16 = arith.extui %15 : vector<32x16xi1> to vector<32x16xi32>
    %17 = arith.sitofp %16 : vector<32x16xi32> to vector<32x16xf32>
    %18 = vector.extract_strided_slice %17 {offsets = [0, 0], sizes = [30, 16], strides = [1, 1]} : vector<32x16xf32> to vector<30x16xf32>
    %19 = vector.extract_strided_slice %17 {offsets = [1, 0], sizes = [30, 16], strides = [1, 1]} : vector<32x16xf32> to vector<30x16xf32>
    %20 = vector.extract_strided_slice %17 {offsets = [2, 0], sizes = [30, 16], strides = [1, 1]} : vector<32x16xf32> to vector<30x16xf32>
    %21 = tpu.concatenate %18, %19, %20 in 1 : vector<30x16xf32>, vector<30x16xf32>, vector<30x16xf32> -> vector<30x48xf32>
    %22 = tpu.concatenate %11, %21 in 0 : vector<30x48xf32>, vector<30x48xf32> -> vector<60x48xf32>
    %23 = arith.truncf %22 : vector<60x48xf32> to vector<60x48xbf16>
    %c0_6 = arith.constant 0 : index
    %c0_7 = arith.constant 0 : index
    %24 = vector.load %arg2[%c0_6, %c0_7] : memref<688x32xbf16, #tpu.memory_space<vmem>>, vector<48x32xbf16>
    %cst = arith.constant dense<0.000000e+00> : vector<60x32xf32>
    %25 = tpu.matmul %23, %24, %cst {dimension_numbers = #tpu.dot_dimension_numbers<[1], [0], [0], [1], [0, 0, 1, 1], [], []>} : vector<60x48xbf16>, vector<48x32xbf16>, vector<60x32xf32> -> vector<60x32xf32>
    %26 = vector.extract_strided_slice %0 {offsets = [0, 0], sizes = [1, 32], strides = [1, 1]} : vector<8x32xf32> to vector<1x32xf32>
    %27 = vector.broadcast %26 : vector<1x32xf32> to vector<60x32xf32>
    %28 = arith.addf %25, %27 : vector<60x32xf32>
    %cst_8 = arith.constant 0.000000e+00 : f32
    %29 = vector.broadcast %cst_8 : f32 to vector<60x32xf32>
    %30 = arith.maximumf %28, %29 : vector<60x32xf32>
    %31 = vector.extract_strided_slice %30 {offsets = [0, 0], sizes = [25, 32], strides = [1, 1]} : vector<60x32xf32> to vector<25x32xf32>
    %32 = vector.extract_strided_slice %30 {offsets = [1, 0], sizes = [25, 32], strides = [1, 1]} : vector<60x32xf32> to vector<25x32xf32>
    %33 = vector.extract_strided_slice %30 {offsets = [2, 0], sizes = [25, 32], strides = [1, 1]} : vector<60x32xf32> to vector<25x32xf32>
    %34 = vector.extract_strided_slice %30 {offsets = [3, 0], sizes = [25, 32], strides = [1, 1]} : vector<60x32xf32> to vector<25x32xf32>
    %35 = vector.extract_strided_slice %30 {offsets = [4, 0], sizes = [25, 32], strides = [1, 1]} : vector<60x32xf32> to vector<25x32xf32>
    %36 = vector.extract_strided_slice %30 {offsets = [5, 0], sizes = [25, 32], strides = [1, 1]} : vector<60x32xf32> to vector<25x32xf32>
    %37 = tpu.concatenate %31, %32, %33, %34, %35, %36 in 1 : vector<25x32xf32>, vector<25x32xf32>, vector<25x32xf32>, vector<25x32xf32>, vector<25x32xf32>, vector<25x32xf32> -> vector<25x192xf32>
    %38 = vector.extract_strided_slice %30 {offsets = [30, 0], sizes = [25, 32], strides = [1, 1]} : vector<60x32xf32> to vector<25x32xf32>
    %39 = vector.extract_strided_slice %30 {offsets = [31, 0], sizes = [25, 32], strides = [1, 1]} : vector<60x32xf32> to vector<25x32xf32>
    %40 = vector.extract_strided_slice %30 {offsets = [32, 0], sizes = [25, 32], strides = [1, 1]} : vector<60x32xf32> to vector<25x32xf32>
    %41 = vector.extract_strided_slice %30 {offsets = [33, 0], sizes = [25, 32], strides = [1, 1]} : vector<60x32xf32> to vector<25x32xf32>
    %42 = vector.extract_strided_slice %30 {offsets = [34, 0], sizes = [25, 32], strides = [1, 1]} : vector<60x32xf32> to vector<25x32xf32>
    %43 = vector.extract_strided_slice %30 {offsets = [35, 0], sizes = [25, 32], strides = [1, 1]} : vector<60x32xf32> to vector<25x32xf32>
    %44 = tpu.concatenate %38, %39, %40, %41, %42, %43 in 1 : vector<25x32xf32>, vector<25x32xf32>, vector<25x32xf32>, vector<25x32xf32>, vector<25x32xf32>, vector<25x32xf32> -> vector<25x192xf32>
    %45 = tpu.concatenate %37, %44 in 0 : vector<25x192xf32>, vector<25x192xf32> -> vector<50x192xf32>
    %46 = arith.truncf %45 : vector<50x192xf32> to vector<50x192xbf16>
    %c48 = arith.constant 48 : index
    %c0_9 = arith.constant 0 : index
    %47 = vector.load %arg2[%c48, %c0_9] : memref<688x32xbf16, #tpu.memory_space<vmem>>, vector<192x32xbf16>
    %cst_10 = arith.constant dense<0.000000e+00> : vector<50x32xf32>
    %48 = tpu.matmul %46, %47, %cst_10 {dimension_numbers = #tpu.dot_dimension_numbers<[1], [0], [0], [1], [0, 0, 1, 1], [], []>} : vector<50x192xbf16>, vector<192x32xbf16>, vector<50x32xf32> -> vector<50x32xf32>
    %49 = vector.extract_strided_slice %0 {offsets = [1, 0], sizes = [1, 32], strides = [1, 1]} : vector<8x32xf32> to vector<1x32xf32>
    %50 = vector.broadcast %49 : vector<1x32xf32> to vector<50x32xf32>
    %51 = arith.addf %48, %50 : vector<50x32xf32>
    %cst_11 = arith.constant 0.000000e+00 : f32
    %52 = vector.broadcast %cst_11 : f32 to vector<50x32xf32>
    %53 = arith.maximumf %51, %52 : vector<50x32xf32>
    %54 = vector.extract_strided_slice %53 {offsets = [0, 0], sizes = [14, 32], strides = [1, 1]} : vector<50x32xf32> to vector<14x32xf32>
    %55 = vector.extract_strided_slice %53 {offsets = [1, 0], sizes = [14, 32], strides = [1, 1]} : vector<50x32xf32> to vector<14x32xf32>
    %56 = vector.extract_strided_slice %53 {offsets = [2, 0], sizes = [14, 32], strides = [1, 1]} : vector<50x32xf32> to vector<14x32xf32>
    %57 = vector.extract_strided_slice %53 {offsets = [3, 0], sizes = [14, 32], strides = [1, 1]} : vector<50x32xf32> to vector<14x32xf32>
    %58 = vector.extract_strided_slice %53 {offsets = [4, 0], sizes = [14, 32], strides = [1, 1]} : vector<50x32xf32> to vector<14x32xf32>
    %59 = vector.extract_strided_slice %53 {offsets = [5, 0], sizes = [14, 32], strides = [1, 1]} : vector<50x32xf32> to vector<14x32xf32>
    %60 = vector.extract_strided_slice %53 {offsets = [6, 0], sizes = [14, 32], strides = [1, 1]} : vector<50x32xf32> to vector<14x32xf32>
    %61 = vector.extract_strided_slice %53 {offsets = [7, 0], sizes = [14, 32], strides = [1, 1]} : vector<50x32xf32> to vector<14x32xf32>
    %62 = vector.extract_strided_slice %53 {offsets = [8, 0], sizes = [14, 32], strides = [1, 1]} : vector<50x32xf32> to vector<14x32xf32>
    %63 = vector.extract_strided_slice %53 {offsets = [9, 0], sizes = [14, 32], strides = [1, 1]} : vector<50x32xf32> to vector<14x32xf32>
    %64 = vector.extract_strided_slice %53 {offsets = [10, 0], sizes = [14, 32], strides = [1, 1]} : vector<50x32xf32> to vector<14x32xf32>
    %65 = vector.extract_strided_slice %53 {offsets = [11, 0], sizes = [14, 32], strides = [1, 1]} : vector<50x32xf32> to vector<14x32xf32>
    %66 = tpu.concatenate %54, %55, %56, %57, %58, %59, %60, %61, %62, %63, %64, %65 in 1 : vector<14x32xf32>, vector<14x32xf32>, vector<14x32xf32>, vector<14x32xf32>, vector<14x32xf32>, vector<14x32xf32>, vector<14x32xf32>, vector<14x32xf32>, vector<14x32xf32>, vector<14x32xf32>, vector<14x32xf32>, vector<14x32xf32> -> vector<14x384xf32>
    %67 = vector.extract_strided_slice %53 {offsets = [25, 0], sizes = [14, 32], strides = [1, 1]} : vector<50x32xf32> to vector<14x32xf32>
    %68 = vector.extract_strided_slice %53 {offsets = [26, 0], sizes = [14, 32], strides = [1, 1]} : vector<50x32xf32> to vector<14x32xf32>
    %69 = vector.extract_strided_slice %53 {offsets = [27, 0], sizes = [14, 32], strides = [1, 1]} : vector<50x32xf32> to vector<14x32xf32>
    %70 = vector.extract_strided_slice %53 {offsets = [28, 0], sizes = [14, 32], strides = [1, 1]} : vector<50x32xf32> to vector<14x32xf32>
    %71 = vector.extract_strided_slice %53 {offsets = [29, 0], sizes = [14, 32], strides = [1, 1]} : vector<50x32xf32> to vector<14x32xf32>
    %72 = vector.extract_strided_slice %53 {offsets = [30, 0], sizes = [14, 32], strides = [1, 1]} : vector<50x32xf32> to vector<14x32xf32>
    %73 = vector.extract_strided_slice %53 {offsets = [31, 0], sizes = [14, 32], strides = [1, 1]} : vector<50x32xf32> to vector<14x32xf32>
    %74 = vector.extract_strided_slice %53 {offsets = [32, 0], sizes = [14, 32], strides = [1, 1]} : vector<50x32xf32> to vector<14x32xf32>
    %75 = vector.extract_strided_slice %53 {offsets = [33, 0], sizes = [14, 32], strides = [1, 1]} : vector<50x32xf32> to vector<14x32xf32>
    %76 = vector.extract_strided_slice %53 {offsets = [34, 0], sizes = [14, 32], strides = [1, 1]} : vector<50x32xf32> to vector<14x32xf32>
    %77 = vector.extract_strided_slice %53 {offsets = [35, 0], sizes = [14, 32], strides = [1, 1]} : vector<50x32xf32> to vector<14x32xf32>
    %78 = vector.extract_strided_slice %53 {offsets = [36, 0], sizes = [14, 32], strides = [1, 1]} : vector<50x32xf32> to vector<14x32xf32>
    %79 = tpu.concatenate %67, %68, %69, %70, %71, %72, %73, %74, %75, %76, %77, %78 in 1 : vector<14x32xf32>, vector<14x32xf32>, vector<14x32xf32>, vector<14x32xf32>, vector<14x32xf32>, vector<14x32xf32>, vector<14x32xf32>, vector<14x32xf32>, vector<14x32xf32>, vector<14x32xf32>, vector<14x32xf32>, vector<14x32xf32> -> vector<14x384xf32>
    %80 = tpu.concatenate %66, %79 in 0 : vector<14x384xf32>, vector<14x384xf32> -> vector<28x384xf32>
    %81 = arith.truncf %80 : vector<28x384xf32> to vector<28x384xbf16>
    %c240 = arith.constant 240 : index
    %c0_12 = arith.constant 0 : index
    %82 = vector.load %arg2[%c240, %c0_12] : memref<688x32xbf16, #tpu.memory_space<vmem>>, vector<384x32xbf16>
    %cst_13 = arith.constant dense<0.000000e+00> : vector<28x32xf32>
    %83 = tpu.matmul %81, %82, %cst_13 {dimension_numbers = #tpu.dot_dimension_numbers<[1], [0], [0], [1], [0, 0, 1, 1], [], []>} : vector<28x384xbf16>, vector<384x32xbf16>, vector<28x32xf32> -> vector<28x32xf32>
    %84 = vector.extract_strided_slice %0 {offsets = [2, 0], sizes = [1, 32], strides = [1, 1]} : vector<8x32xf32> to vector<1x32xf32>
    %85 = vector.broadcast %84 : vector<1x32xf32> to vector<28x32xf32>
    %86 = arith.addf %83, %85 : vector<28x32xf32>
    %cst_14 = arith.constant 0.000000e+00 : f32
    %87 = vector.broadcast %cst_14 : f32 to vector<28x32xf32>
    %88 = arith.maximumf %86, %87 : vector<28x32xf32>
    %89 = arith.truncf %88 : vector<28x32xf32> to vector<28x32xbf16>
    %c624 = arith.constant 624 : index
    %c0_15 = arith.constant 0 : index
    %90 = vector.load %arg2[%c624, %c0_15] : memref<688x32xbf16, #tpu.memory_space<vmem>>, vector<32x32xbf16>
    %cst_16 = arith.constant dense<0.000000e+00> : vector<28x32xf32>
    %91 = tpu.matmul %89, %90, %cst_16 {dimension_numbers = #tpu.dot_dimension_numbers<[1], [0], [0], [1], [0, 0, 1, 1], [], []>} : vector<28x32xbf16>, vector<32x32xbf16>, vector<28x32xf32> -> vector<28x32xf32>
    %92 = vector.extract_strided_slice %0 {offsets = [3, 0], sizes = [1, 32], strides = [1, 1]} : vector<8x32xf32> to vector<1x32xf32>
    %93 = vector.broadcast %92 : vector<1x32xf32> to vector<28x32xf32>
    %94 = arith.addf %91, %93 : vector<28x32xf32>
    %cst_17 = arith.constant 0.000000e+00 : f32
    %95 = vector.broadcast %cst_17 : f32 to vector<28x32xf32>
    %96 = arith.maximumf %94, %95 : vector<28x32xf32>
    %97 = arith.truncf %96 : vector<28x32xf32> to vector<28x32xbf16>
    %c656 = arith.constant 656 : index
    %c0_18 = arith.constant 0 : index
    %98 = vector.load %arg2[%c656, %c0_18] : memref<688x32xbf16, #tpu.memory_space<vmem>>, vector<32x32xbf16>
    %cst_19 = arith.constant dense<0.000000e+00> : vector<28x32xf32>
    %99 = tpu.matmul %97, %98, %cst_19 {dimension_numbers = #tpu.dot_dimension_numbers<[1], [0], [0], [1], [0, 0, 1, 1], [], []>} : vector<28x32xbf16>, vector<32x32xbf16>, vector<28x32xf32> -> vector<28x32xf32>
    %100 = vector.extract_strided_slice %0 {offsets = [4, 0], sizes = [1, 32], strides = [1, 1]} : vector<8x32xf32> to vector<1x32xf32>
    %101 = vector.broadcast %100 : vector<1x32xf32> to vector<28x32xf32>
    %102 = arith.addf %99, %101 : vector<28x32xf32>
    %cst_20 = arith.constant 0.000000e+00 : f32
    %103 = vector.broadcast %cst_20 : f32 to vector<28x32xf32>
    %104 = arith.maximumf %102, %103 : vector<28x32xf32>
    %c0_21 = arith.constant 0 : index
    %c0_22 = arith.constant 0 : index
    %105 = vector.load %arg4[%c0_21, %c0_22] : memref<32x32xf32, #tpu.memory_space<vmem>>, vector<32x32xf32>
    %cst_23 = arith.constant dense<0.000000e+00> : vector<28x32xf32>
    %106 = tpu.matmul %104, %105, %cst_23 {dimension_numbers = #tpu.dot_dimension_numbers<[1], [0], [0], [1], [0, 0, 1, 1], [], []>} : vector<28x32xf32>, vector<32x32xf32>, vector<28x32xf32> -> vector<28x32xf32>
    %107 = vector.extract_strided_slice %0 {offsets = [5, 0], sizes = [1, 32], strides = [1, 1]} : vector<8x32xf32> to vector<1x32xf32>
    %108 = vector.broadcast %107 : vector<1x32xf32> to vector<28x32xf32>
    %109 = arith.addf %106, %108 : vector<28x32xf32>
    %cst_24 = arith.constant 0.000000e+00 : f32
    %110 = vector.broadcast %cst_24 : f32 to vector<2x32xf32>
    %111 = vector.extract_strided_slice %109 {offsets = [0, 0], sizes = [14, 32], strides = [1, 1]} : vector<28x32xf32> to vector<14x32xf32>
    %112 = vector.extract_strided_slice %109 {offsets = [14, 0], sizes = [14, 32], strides = [1, 1]} : vector<28x32xf32> to vector<14x32xf32>
    %113 = tpu.concatenate %111, %110, %112, %110 in 0 : vector<14x32xf32>, vector<2x32xf32>, vector<14x32xf32>, vector<2x32xf32> -> vector<32x32xf32>
    %114 = tpu.transpose %113, [1, 0] : vector<32x32xf32> -> vector<32x32xf32>
    %115 = tpu.iota {dimensions = array<i32: 1>} : vector<1x16xi32>
    %116 = vector.extract_strided_slice %114 {offsets = [0, 0], sizes = [32, 16], strides = [1, 1]} : vector<32x32xf32> to vector<32x16xf32>
    %117 = vector.extract_strided_slice %116 {offsets = [0, 0], sizes = [4, 16], strides = [1, 1]} : vector<32x16xf32> to vector<4x16xf32>
    %118 = vector.extract_strided_slice %116 {offsets = [4, 0], sizes = [1, 16], strides = [1, 1]} : vector<32x16xf32> to vector<1x16xf32>
    %c14_i32 = arith.constant 14 : i32
    %119 = vector.broadcast %c14_i32 : i32 to vector<1x16xi32>
    %120 = arith.cmpi slt, %115, %119 : vector<1x16xi32>
    %cst_25 = arith.constant -1.000000e+30 : f32
    %121 = vector.broadcast %cst_25 : f32 to vector<1x16xf32>
    %122 = arith.select %120, %118, %121 : vector<1x16xi1>, vector<1x16xf32>
    %cst_26 = arith.constant dense<0xFF800000> : vector<1xf32>
    %123 = vector.multi_reduction <maximumf>, %122, %cst_26 [1] : vector<1x16xf32> to vector<1xf32>
    %124 = vector.shape_cast %123 : vector<1xf32> to vector<1x1xf32>
    %125 = vector.broadcast %124 : vector<1x1xf32> to vector<1x16xf32>
    %126 = arith.subf %122, %125 : vector<1x16xf32>
    %127 = math.exp %126 : vector<1x16xf32>
    %cst_27 = arith.constant dense<0.000000e+00> : vector<1xf32>
    %128 = vector.multi_reduction <add>, %127, %cst_27 [1] : vector<1x16xf32> to vector<1xf32>
    %129 = vector.shape_cast %128 : vector<1xf32> to vector<1x1xf32>
    %130 = vector.broadcast %129 : vector<1x1xf32> to vector<1x16xf32>
    %131 = arith.divf %127, %130 : vector<1x16xf32>
    %132 = vector.broadcast %131 : vector<1x16xf32> to vector<4x16xf32>
    %133 = arith.mulf %132, %117 : vector<4x16xf32>
    %cst_28 = arith.constant dense<0.000000e+00> : vector<4xf32>
    %134 = vector.multi_reduction <add>, %133, %cst_28 [1] : vector<4x16xf32> to vector<4xf32>
    %135 = vector.shape_cast %134 : vector<4xf32> to vector<4x1xf32>
    %136 = vector.extract_strided_slice %117 {offsets = [0, 0], sizes = [4, 15], strides = [1, 1]} : vector<4x16xf32> to vector<4x15xf32>
    %137 = tpu.concatenate %136, %135 in 1 : vector<4x15xf32>, vector<4x1xf32> -> vector<4x16xf32>
    %cst_29 = arith.constant 0.000000e+00 : f32
    %138 = vector.broadcast %cst_29 : f32 to vector<3x16xf32>
    %139 = tpu.concatenate %137, %131, %138 in 0 : vector<4x16xf32>, vector<1x16xf32>, vector<3x16xf32> -> vector<8x16xf32>
    %cst_30 = arith.constant 0.000000e+00 : f32
    %140 = vector.broadcast %cst_30 : f32 to vector<8x112xf32>
    %141 = tpu.concatenate %139, %140 in 1 : vector<8x16xf32>, vector<8x112xf32> -> vector<8x128xf32>
    %c0_31 = arith.constant 0 : index
    %c0_32 = arith.constant 0 : index
    %c0_33 = arith.constant 0 : index
    %142 = vector.load %arg5[%c0_31, %c0_32, %c0_33] : memref<2x8x128xf32, #tpu.memory_space<vmem>>, vector<1x8x128xf32>
    %143 = vector.shape_cast %142 : vector<1x8x128xf32> to vector<8x128xf32>
    %144 = vector.shape_cast %141 : vector<8x128xf32> to vector<1x8x128xf32>
    tpu.vector_store %arg5[%c0_31, %c0_32, %c0_33], %144 {strides = array<i32>} : memref<2x8x128xf32, #tpu.memory_space<vmem>>, vector<1x8x128xf32>,
    %145 = vector.extract_strided_slice %114 {offsets = [0, 16], sizes = [32, 16], strides = [1, 1]} : vector<32x32xf32> to vector<32x16xf32>
    %146 = vector.extract_strided_slice %145 {offsets = [0, 0], sizes = [4, 16], strides = [1, 1]} : vector<32x16xf32> to vector<4x16xf32>
    %147 = vector.extract_strided_slice %145 {offsets = [4, 0], sizes = [1, 16], strides = [1, 1]} : vector<32x16xf32> to vector<1x16xf32>
    %c14_i32_34 = arith.constant 14 : i32
    %148 = vector.broadcast %c14_i32_34 : i32 to vector<1x16xi32>
    %149 = arith.cmpi slt, %115, %148 : vector<1x16xi32>
    %cst_35 = arith.constant -1.000000e+30 : f32
    %150 = vector.broadcast %cst_35 : f32 to vector<1x16xf32>
    %151 = arith.select %149, %147, %150 : vector<1x16xi1>, vector<1x16xf32>
    %cst_36 = arith.constant dense<0xFF800000> : vector<1xf32>
    %152 = vector.multi_reduction <maximumf>, %151, %cst_36 [1] : vector<1x16xf32> to vector<1xf32>
    %153 = vector.shape_cast %152 : vector<1xf32> to vector<1x1xf32>
    %154 = vector.broadcast %153 : vector<1x1xf32> to vector<1x16xf32>
    %155 = arith.subf %151, %154 : vector<1x16xf32>
    %156 = math.exp %155 : vector<1x16xf32>
    %cst_37 = arith.constant dense<0.000000e+00> : vector<1xf32>
    %157 = vector.multi_reduction <add>, %156, %cst_37 [1] : vector<1x16xf32> to vector<1xf32>
    %158 = vector.shape_cast %157 : vector<1xf32> to vector<1x1xf32>
    %159 = vector.broadcast %158 : vector<1x1xf32> to vector<1x16xf32>
    %160 = arith.divf %156, %159 : vector<1x16xf32>
    %161 = vector.broadcast %160 : vector<1x16xf32> to vector<4x16xf32>
    %162 = arith.mulf %161, %146 : vector<4x16xf32>
    %cst_38 = arith.constant dense<0.000000e+00> : vector<4xf32>
    %163 = vector.multi_reduction <add>, %162, %cst_38 [1] : vector<4x16xf32> to vector<4xf32>
    %164 = vector.shape_cast %163 : vector<4xf32> to vector<4x1xf32>
    %165 = vector.extract_strided_slice %146 {offsets = [0, 0], sizes = [4, 15], strides = [1, 1]} : vector<4x16xf32> to vector<4x15xf32>
    %166 = tpu.concatenate %165, %164 in 1 : vector<4x15xf32>, vector<4x1xf32> -> vector<4x16xf32>
    %cst_39 = arith.constant 0.000000e+00 : f32
    %167 = vector.broadcast %cst_39 : f32 to vector<3x16xf32>
    %168 = tpu.concatenate %166, %160, %167 in 0 : vector<4x16xf32>, vector<1x16xf32>, vector<3x16xf32> -> vector<8x16xf32>
    %cst_40 = arith.constant 0.000000e+00 : f32
    %169 = vector.broadcast %cst_40 : f32 to vector<8x112xf32>
    %170 = tpu.concatenate %168, %169 in 1 : vector<8x16xf32>, vector<8x112xf32> -> vector<8x128xf32>
    %c1_41 = arith.constant 1 : index
    %c0_42 = arith.constant 0 : index
    %c0_43 = arith.constant 0 : index
    %171 = vector.load %arg5[%c1_41, %c0_42, %c0_43] : memref<2x8x128xf32, #tpu.memory_space<vmem>>, vector<1x8x128xf32>
    %172 = vector.shape_cast %171 : vector<1x8x128xf32> to vector<8x128xf32>
    %173 = vector.shape_cast %170 : vector<8x128xf32> to vector<1x8x128xf32>
    tpu.vector_store %arg5[%c1_41, %c0_42, %c0_43], %173 {strides = array<i32>} : memref<2x8x128xf32, #tpu.memory_space<vmem>>, vector<1x8x128xf32>,
    return
  }
  func.func @transform_0(%arg0: i32) -> (i32, i32, i32) {
    %c0_i32 = arith.constant 0 : i32
    %c0_i32_0 = arith.constant 0 : i32
    %c0_i32_1 = arith.constant 0 : i32
    %c0_i32_2 = arith.constant 0 : i32
    return %c0_i32, %c0_i32_0, %c0_i32_1 : i32, i32, i32
  }
  func.func @transform_1(%arg0: i32) -> (i32, i32) {
    %c0_i32 = arith.constant 0 : i32
    %c0_i32_0 = arith.constant 0 : i32
    %c0_i32_1 = arith.constant 0 : i32
    return %c0_i32, %c0_i32_0 : i32, i32
  }
  func.func @transform_2(%arg0: i32) -> (i32, i32) {
    %c0_i32 = arith.constant 0 : i32
    %c0_i32_0 = arith.constant 0 : i32
    %c0_i32_1 = arith.constant 0 : i32
    return %c0_i32, %c0_i32_0 : i32, i32
  }
  func.func @transform_3(%arg0: i32) -> (i32, i32) {
    %c0_i32 = arith.constant 0 : i32
    %c0_i32_0 = arith.constant 0 : i32
    %c0_i32_1 = arith.constant 0 : i32
    return %c0_i32, %c0_i32_0 : i32, i32
  }
  func.func @transform_4(%arg0: i32) -> (i32, i32, i32) {
    %c0_i32 = arith.constant 0 : i32
    %c0_i32_0 = arith.constant 0 : i32
    %c0_i32_1 = arith.constant 0 : i32
    %c0_i32_2 = arith.constant 0 : i32
    return %c0_i32, %c0_i32_0, %c0_i32_1 : i32, i32, i32
  }
}

</mosaic_0001>

<bundles_post_ra>
// kernel: net_forward.1
= control target key start
LH: loop header
LB: loop body
LE: loop exit
PB: predicated region body
PF: predicated region fallthrough
CT: control target
= control target key end

     0   :  { %v2158_v0 = vmov 0   ;;  %v19_v9 = vlaneseq  ;;  %v2159_v13 = vmov 0.0   ;;  %vm73_vm2 = vcmask 1045504   ;;  %s2160_s8 = smov 32   ;;  %s2161_s11 = smov 16   ;;  %s2891_s0 = inlined_call_operand.vmem [shape: s32[2,32,1], index: 0, kind: input, shape index: {}]   ;;  %s2892_s1 = inlined_call_operand.vmem [shape: bf16[688,32], index: 1, kind: input, shape index: {}]   ;;  %s2893_s2 = inlined_call_operand.vmem [shape: f32[8,32], index: 2, kind: input, shape index: {}]   ;;  %s2894_s3 = inlined_call_operand.vmem [shape: f32[32,32], index: 3, kind: input, shape index: {}]   ;;  %s2895_s4 = inlined_call_operand.vmem [shape: f32[2,8,128], index: 4, kind: output, shape index: {}]  }
   0x1   :  { %1905 = vset.pattern.permute.xlu1 %v2158_v0  ;;  %1904 = vset.pattern.permute.xlu0 %v2158_v0  ;;  %v1696_v1 = vld [vmem:[%s2891_s0 + $0x20] sm:$0xff]  ;;  %v1697_v3 = vld [vmem:[%s2891_s0 + $0x28] sm:$0xff]  ;;  %v23_v5 = vld [vmem:[%s2891_s0 + $0x10] sm:$0xff]  ;;  %vm53_vm3 = vcmask 1046528   ;;  %vm93_vm10 = vcmask 130048   ;;  %vm98_vm11 = vcmask 261120  }
   0x2   :  { %v21_v2 = vld [vmem:[%s2891_s0] sm:$0xff]  ;;  %109 = vperm.xlu0 %1904, %v1696_v1   ;;  %v22_v4 = vld [vmem:[%s2891_s0 + $0x8] sm:$0xff]  ;;  %688 = vmatprep.subr.bf16.mxu1 %v2158_v0  ;;  %v24_v6 = vld [vmem:[%s2891_s0 + $0x18] sm:$0xff]  ;;  %v2218_v10 = vand.u32 127, %v19_v9  ;;  %vm231_vm12 = vcmask 392192   ;;  %vm359_vm13 = vcmask 1044480  }
   0x3   :  { %26 = vperm.xlu1 %1905, %v21_v2   ;;  %v1698_v7 = vld [vmem:[%s2891_s0 + $0x30] sm:$0xff]  ;;  %v1699_v8 = vld [vmem:[%s2891_s0 + $0x38] sm:$0xff]  ;;  %v2106_v22 = vld [vmem:[%s2892_s1] sm:$0xff]   ;;  %s2162_s12 = smov 64   ;;  %vm391_vm14 = vcmask 1042432   ;;  %s2163_s13 = smov 96  }
   0x4   :  { %1825 = vmatprep.subr.bf16.mxu0 %v2106_v22  ;;  %v2107_v33 = vld [vmem:[%s2892_s1 + $0x8] sm:$0xff]   ;;  %v2108_v46 = vld [vmem:[%s2892_s1 + $0x10] sm:$0xff]   ;;  %vm379_vm15 = vcmask 1043456  }
   0x5   :  { %1826 = vmatpush3.bf16.msra.mxu0 %v2106_v22 }
   0x6   :  { %112 = vperm.xlu0 %1904, %v1697_v3   ;;  %1827 = vmatprep.subr.bf16.mxu0 %v2107_v33 }
   0x7   :  { %29 = vperm.xlu1 %1905, %v22_v4  }
   0x9   :  { %1828 = vmatpush3.bf16.msra.mxu0 %v2107_v33 }
   0xa   :  { %32 = vperm.xlu0 %1904, %v23_v5   ;;  %1829 = vmatprep.subr.bf16.mxu0 %v2108_v46 }
   0xb   :  { %35 = vperm.xlu1 %1905, %v24_v6  }
   0xd   :  { %1830 = vmatpush3.bf16.msra.mxu0 %v2108_v46 }
   0xe   :  { %115 = vperm.xlu0 %1904, %v1698_v7  }
   0xf   :  { %118 = vperm.xlu1 %1905, %v1699_v8  }
  0x81   :  { %v110_v11 = vpop.permute.xlu0 %109 }
  0x82   :  { %v27_v12 = vpop.permute.xlu1 %26  ;;  %vm120_vm0 = vcmp.eq.s32.totalorder %v110_v11, %v2218_v10 }
  0x83   :  { %vm37_vm1 = vcmp.eq.s32.totalorder %v27_v12, %v2218_v10  ;;  %v2222_v14 = vsel %vm120_vm0, 1.0, %v2159_v13  ;;  %vm415_vm0 = vcmask 523264  }
  0x84   :  { %v2224_v15 = vsel %vm37_vm1, 1.0, %v2159_v13  ;;  %v136_v16 = vrot.slane %v2222_v14, 1  ;;  %v155_v17 = vrot.slane %v2222_v14, 2  ;;  %vm420_vm1 = vcmask 785408  }
  0x85   :  { %v54_v18 = vrot.slane %v2224_v15, 1  ;;  %v113_v19 = vpop.permute.xlu0 %112  ;;  %v74_v21 = vrot.slane %v2224_v15, 2 }
  0x86   :  { %v30_v20 = vpop.permute.xlu1 %29  ;;  %vm121_vm4 = vcmp.eq.s32.totalorder %v113_v19, %v2218_v10 }
  0x87   :  { %vm38_vm5 = vcmp.eq.s32.totalorder %v30_v20, %v2218_v10  ;;  %v2235_v23 = vsel %vm121_vm4, 1.0, %v2159_v13  ;;  %vm565_vm4 = vcmask 1040384  }
  0x88   :  { %v2237_v24 = vsel %vm38_vm5, 1.0, %v2159_v13  ;;  %v137_v25 = vrot.slane %v2235_v23, 1  ;;  %v156_v26 = vrot.slane %v2235_v23, 2  ;;  %vm809_vm5 = vcmask 1041408  }
  0x89   :  { %v55_v27 = vrot.slane %v2237_v24, 1  ;;  %v75_v28 = vrot.slane %v2237_v24, 2  ;;  %v33_v29 = vpop.permute.xlu0 %32 }
  0x8a   :  { %v36_v30 = vpop.permute.xlu1 %35  ;;  %vm39_vm6 = vcmp.eq.s32.totalorder %v33_v29, %v2218_v10  ;;  %v157_v32 = vsel %vm73_vm2, %v155_v17, %v156_v26  ;;  %v138_v42 = vsel %vm53_vm3, %v136_v16, %v137_v25 }
  0x8b   :  { %vm40_vm7 = vcmp.eq.s32.totalorder %v36_v30, %v2218_v10  ;;  %v76_v31 = vsel %vm73_vm2, %v74_v21, %v75_v28  ;;  %v2250_v34 = vsel %vm39_vm6, 1.0, %v2159_v13  ;;  %v56_v37 = vsel %vm53_vm3, %v54_v18, %v55_v27 }
  0x8c   :  { %v2252_v35 = vsel %vm40_vm7, 1.0, %v2159_v13  ;;  %v1911_v36 = vpack.i.bf16 %v76_v31, %v157_v32  ;;  %v57_v38 = vrot.slane %v2250_v34, 1  ;;  %v77_v39 = vrot.slane %v2250_v34, 2 }
  0x8d   :  { %v59_v40 = vrot.slane %v2252_v35, 1  ;;  %v116_v41 = vpop.permute.xlu0 %115  ;;  %v1906_v44 = vpack.i.bf16 %v56_v37, %v138_v42  ;;  %v79_v49 = vrot.slane %v2252_v35, 2  ;;  %vm1623_vm6 = vcmask 126980  }
  0x8e   :  { %1912 = vrot.lane.b32.xlu1 %v1911_v36, %s2160_s8  ;;  %v119_v43 = vpop.permute.xlu1 %118  ;;  %vm122_vm8 = vcmp.eq.s32.totalorder %v116_v41, %v2218_v10  ;;  %v58_v45 = vsel %vm53_vm3, %v55_v27, %v57_v38  ;;  %v78_v57 = vsel %vm73_vm2, %v75_v28, %v77_v39  ;;  %vm1656_vm7 = vcmask 122880  }
  0x8f   :  { %vm123_vm9 = vcmp.eq.s32.totalorder %v119_v43, %v2218_v10  ;;  %v2266_v47 = vsel %vm122_vm8, 1.0, %v2159_v13  ;;  %1907 = vrot.lane.b32.xlu0 %v1906_v44, %s2161_s11  ;;  %v1916_v52 = vpack.i.bf16 %v59_v40, %v58_v45  ;;  %v60_v55 = vsel %vm53_vm3, %v57_v38, %v59_v40 }
  0x90   :  { %v2268_v48 = vsel %vm123_vm9, 1.0, %v2159_v13  ;;  %v139_v50 = vrot.slane %v2266_v47, 1  ;;  %v158_v51 = vrot.slane %v2266_v47, 2  ;;  %v1926_v60 = vpack.i.bf16 %v79_v49, %v78_v57 }
  0x91   :  { %v141_v53 = vrot.slane %v2268_v48, 1  ;;  %v160_v54 = vrot.slane %v2268_v48, 2  ;;  %v80_v61 = vsel %vm73_vm2, %v77_v39, %v79_v49  ;;  %vm1644_vm8 = vcmask 121856  }
  0x92   :  { %v140_v56 = vsel %vm53_vm3, %v137_v25, %v139_v50  ;;  %v159_v59 = vsel %vm73_vm2, %v156_v26, %v158_v51 }
  0x93   :  { %v1921_v58 = vpack.i.bf16 %v140_v56, %v60_v55  ;;  %1917 = vrot.lane.b32.xlu0 %v1916_v52, %s2161_s11  ;;  %v1931_v62 = vpack.i.bf16 %v159_v59, %v80_v61  ;;  %v142_v63 = vsel %vm53_vm3, %v139_v50, %v141_v53  ;;  %v161_v1 = vsel %vm73_vm2, %v158_v51, %v160_v54  ;;  %v2110_v59 = vld [vmem:[%s2892_s1 + $0x20] sm:$0xff]   ;;  %v2112_v61 = vld [vmem:[%s2892_s1 + $0x30] sm:$0xff]  }
  0x94   :  { %v1936_v2 = vpack.i.bf16 %v141_v53, %v142_v63  ;;  %v1941_v3 = vpack.i.bf16 %v160_v54, %v161_v1  ;;  %v2114_v63 = vld [vmem:[%s2892_s1 + $0x40] sm:$0xff]   ;;  %v2115_v1 = vld [vmem:[%s2892_s1 + $0x48] sm:$0xff]  }
  0x95   :  { %1922 = vrot.lane.b32.xlu1 %v1921_v58, %s2161_s11 }
  0x97   :  { %1927 = vrot.lane.b32.xlu0 %v1926_v60, %s2160_s8  ;;  %v2111_v60 = vld [vmem:[%s2892_s1 + $0x28] sm:$0xff]  }
  0x99   :  { %1932 = vrot.lane.b32.xlu1 %v1931_v62, %s2160_s8  ;;  %v2113_v62 = vld [vmem:[%s2892_s1 + $0x38] sm:$0xff]  }
  0x9b   :  { %1937 = vrot.lane.b32.xlu0 %v1936_v2, %s2161_s11  ;;  %v2116_v2 = vld [vmem:[%s2892_s1 + $0x50] sm:$0xff]  }
  0x9d   :  { %1942 = vrot.lane.b32.xlu1 %v1941_v3, %s2160_s8  ;;  %v2117_v3 = vld [vmem:[%s2892_s1 + $0x58] sm:$0xff]  }
 0x100   :  { %v1913_v4 = vpop.permute.xlu1 %1912 }
 0x101   :  { %v1908_v5 = vpop.permute.xlu0 %1907  ;;  %v1914_v8 = vunpack.i.l.bf16 %v1913_v4  ;;  %v1915_v13 = vunpack.i.h.bf16 %v1913_v4  ;;  %v2354_v4 = vshrl.u32 %v19_v9, 7  ;;  %v2118_v9 = vld [vmem:[%s2892_s1 + $0x60] sm:$0xff]  }
 0x102   :  { %v1909_v6 = vunpack.i.l.bf16 %v1908_v5  ;;  %v1910_v7 = vunpack.i.h.bf16 %v1908_v5 }
 0x103   :  { %v211_v5 = vsub.s32 0, %v2354_v4 }
 0x104   :  { %v174_v11 = vsel %vm93_vm10, %v2222_v14, %v1909_v6  ;;  %v94_v20 = vsel %vm93_vm10, %v2224_v15, %v1910_v7  ;;  %v2360_v6 = vld [vmem:[%s2893_s2] sm:$0xff] }
 0x105   :  { %v1918_v12 = vpop.permute.xlu0 %1917  ;;  %v178_v17 = vsel %vm98_vm11, %v174_v11, %v1914_v8  ;;  %v99_v14 = vsel %vm98_vm11, %v94_v20, %v1915_v13  ;;  %v2365_v7 = vrot.slane %v2360_v6, %v211_v5 }
 0x106   :  { %v1920_v18 = vunpack.i.h.bf16 %v1918_v12  ;;  %v1919_v19 = vunpack.i.l.bf16 %v1918_v12  ;;  %v186_v26 = vrot.slane %v178_v17, 2 }
 0x107   :  { %v1923_v16 = vpop.permute.xlu1 %1922 }
 0x108   :  { %v1925_v21 = vunpack.i.h.bf16 %v1923_v16  ;;  %v1924_v22 = vunpack.i.l.bf16 %v1923_v16  ;;  %v97_v30 = vsel %vm93_vm10, %v2252_v35, %v1920_v18  ;;  %v95_v33 = vsel %vm93_vm10, %v2237_v24, %v1919_v19 }
 0x109   :  { %v1928_v25 = vpop.permute.xlu0 %1927 }
 0x10a   :  { %v1930_v27 = vunpack.i.h.bf16 %v1928_v25  ;;  %v1929_v28 = vunpack.i.l.bf16 %v1928_v25  ;;  %v175_v36 = vsel %vm93_vm10, %v2235_v23, %v1925_v21  ;;  %v96_v37 = vsel %vm93_vm10, %v2250_v34, %v1924_v22  ;;  %v2119_v25 = vld [vmem:[%s2892_s1 + $0x68] sm:$0xff]  }
 0x10b   :  { %v1933_v29 = vpop.permute.xlu1 %1932 }
 0x10c   :  { %v1935_v31 = vunpack.i.h.bf16 %v1933_v29  ;;  %v1934_v32 = vunpack.i.l.bf16 %v1933_v29  ;;  %v102_v15 = vsel %vm98_vm11, %v97_v30, %v1930_v27  ;;  %v100_v38 = vsel %vm98_vm11, %v95_v33, %v1929_v28  ;;  %v2120_v30 = vld [vmem:[%s2892_s1 + $0x70] sm:$0xff]  }
 0x10d   :  { %v1938_v39 = vpop.permute.xlu0 %1937  ;;  %v198_v41 = vsel %vm73_vm2, %v102_v15, %v186_v26  ;;  %v199_v42 = vpack.c.bf16 %v100_v38, %v99_v14 }
 0x10e   :  { %v101_v40 = vsel %vm98_vm11, %v96_v37, %v1934_v32  ;;  %v179_v35 = vsel %vm98_vm11, %v175_v36, %v1935_v31  ;;  %v1940_v43 = vunpack.i.h.bf16 %v1938_v39  ;;  %v1939_v24 = vunpack.i.l.bf16 %v1938_v39 }
 0x10f   :  { %v200_v44 = vpack.c.bf16 %v198_v41, %v101_v40  ;;  %v1943_v45 = vpop.permute.xlu1 %1942  ;;  %1831 = vmatprep.mubr.msk.bf16.mxu0 %vm231_vm12, %v199_v42  ;;  %v187_v50 = vrot.slane %v179_v35, 2 }
 0x110   :  { %v1945_v23 = vunpack.i.h.bf16 %v1943_v45  ;;  %v1944_v46 = vunpack.i.l.bf16 %v1943_v45  ;;  %v177_v34 = vsel %vm93_vm10, %v2268_v48, %v1940_v43  ;;  %v176_v49 = vsel %vm93_vm10, %v2266_v47, %v1939_v24  ;;  %v2109_v47 = vld [vmem:[%s2892_s1 + $0x18] sm:$0xff]  }
 0x111   :  { %1832 = vmatmul.mubr.msk.bf16.vlgmr.msra.gmra.mrb[0].mxu0 %vm231_vm12, %v200_v44  ;;  %v188_v55 = vsel %vm73_vm2, %v186_v26, %v187_v50  ;;  %689 = vmatpush1.bf16.msra.mxu1 %v2109_v47 }
 0x112   :  { %v181_v51 = vsel %vm98_vm11, %v177_v34, %v1945_v23  ;;  %v180_v52 = vsel %vm98_vm11, %v176_v49, %v1944_v46  ;;  %690 = vmatprep.subr.bf16.mxu1 %v2158_v0 }
 0x113   :  { %v191_v53 = vrot.slane %v181_v51, 2  ;;  %v189_v54 = vrot.slane %v180_v52, 2 }
 0x115   :  { %v190_v56 = vsel %vm73_vm2, %v187_v50, %v189_v54  ;;  %v192_v57 = vsel %vm73_vm2, %v189_v54, %v191_v53  ;;  %691 = vmatpush1.bf16.msra.mxu1 %v2110_v59 }
 0x116   :  { %v201_v58 = vpack.c.bf16 %v190_v56, %v188_v55  ;;  %v202_v48 = vpack.c.bf16 %v191_v53, %v192_v57  ;;  %692 = vmatprep.subr.bf16.mxu1 %v2158_v0 }
 0x118   :  { %1835 = vmatprep.mubr.msk.bf16.mxu0 %vm231_vm12, %v201_v58 }
 0x119   :  { %1836 = vmatmul.mubr.msk.bf16.gmra.mrb[4].mxu0 %vm231_vm12, %v202_v48  ;;  %693 = vmatpush1.bf16.msra.mxu1 %v2111_v60 }
 0x11a   :  { %694 = vmatprep.subr.bf16.mxu1 %v2158_v0 }
 0x11d   :  { %695 = vmatpush1.bf16.msra.mxu1 %v2112_v61 }
 0x11e   :  { %696 = vmatprep.subr.bf16.mxu1 %v2158_v0 }
 0x121   :  { %697 = vmatpush1.bf16.msra.mxu1 %v2113_v62 }
 0x122   :  { %698 = vmatprep.subr.bf16.mxu1 %v2158_v0 }
 0x125   :  { %699 = vmatpush1.bf16.msra.mxu1 %v2114_v63 }
 0x126   :  { %700 = vmatprep.subr.bf16.mxu1 %v2158_v0 }
 0x129   :  { %701 = vmatpush1.bf16.msra.mxu1 %v2115_v1 }
 0x12a   :  { %702 = vmatprep.subr.bf16.mxu1 %v2158_v0 }
 0x12d   :  { %703 = vmatpush1.bf16.msra.mxu1 %v2116_v2 }
 0x12e   :  { %704 = vmatprep.subr.bf16.mxu1 %v2158_v0 }
 0x131   :  { %705 = vmatpush1.bf16.msra.mxu1 %v2117_v3 }
 0x132   :  { %706 = vmatprep.subr.bf16.mxu1 %v2158_v0 }
 0x135   :  { %707 = vmatpush1.bf16.msra.mxu1 %v2118_v9 }
 0x136   :  { %708 = vmatprep.subr.bf16.mxu1 %v2158_v0 }
 0x139   :  { %709 = vmatpush1.bf16.msra.mxu1 %v2119_v25 }
 0x13a   :  { %710 = vmatprep.subr.bf16.mxu1 %v2158_v0 }
 0x13d   :  { %711 = vmatpush1.bf16.msra.mxu1 %v2120_v30 }
 0x1e4   :  { %v1833_v8 = vpop.f32.mrb[0].mxu0 }
 0x1e5   :  { %v287_v11 = vadd.f32 %v1833_v8, %v2365_v7  ;;  %v278_v12 = vpop.f32.mrb[1].mxu0 }
 0x1e6   :  { %v279_v13 = vadd.f32 %v278_v12, %v2365_v7  ;;  %v1834_v16 = vpop.f32.mrb[2].mxu0 }
 0x1e7   :  { %v2372_v17 = vmax.f32 %v287_v11, 0.0  ;;  %v290_v18 = vadd.f32 %v1834_v16, %v2365_v7  ;;  %v281_v19 = vpop.f32.mrb[3].mxu0 }
 0x1e8   :  { %v282_v20 = vadd.f32 %v281_v19, %v2365_v7  ;;  %v2377_v21 = vmax.f32 %v279_v13, 0.0 }
 0x1e9   :  { %v2379_v22 = vmax.f32 %v290_v18, 0.0  ;;  %v343_v27 = vrot.slane %v2372_v17, 2  ;;  %v324_v29 = vrot.slane %v2372_v17, 1  ;;  %v363_v49 = vrot.slane %v2372_v17, 3 }
 0x1ea   :  { %v2384_v26 = vmax.f32 %v282_v20, 0.0  ;;  %v340_v38 = vrot.slane %v2377_v21, 2  ;;  %v321_v39 = vrot.slane %v2377_v21, 1  ;;  %v360_v51 = vrot.slane %v2377_v21, 3 }
 0x1eb   :  { %v345_v28 = vrot.slane %v2379_v22, 2  ;;  %v326_v14 = vrot.slane %v2379_v22, 1  ;;  %v392_v52 = vrot.slane %v2377_v21, 5  ;;  %v395_v53 = vrot.slane %v2372_v17, 5 }
 0x1ec   :  { %v1837_v31 = vpop.f32.mrb[4].mxu0  ;;  %v341_v32 = vrot.slane %v2384_v26, 2  ;;  %v322_v33 = vrot.slane %v2384_v26, 1  ;;  %v361_v43 = vrot.slane %v2384_v26, 3  ;;  %v393_v23 = vrot.slane %v2384_v26, 5 }
 0x1ed   :  { %v294_v15 = vpop.f32.mrb[5].mxu0  ;;  %v346_v36 = vsel %vm73_vm2, %v343_v27, %v345_v28  ;;  %v327_v37 = vsel %vm53_vm3, %v324_v29, %v326_v14  ;;  %v303_v9 = vadd.f32 %v1837_v31, %v2365_v7  ;;  %v365_v25 = vrot.slane %v2379_v22, 3 }
 0x1ee   :  { %v295_v40 = vadd.f32 %v294_v15, %v2365_v7  ;;  %v1838_v35 = vpop.f32.mrb[6].mxu0  ;;  %v1951_v41 = vpack.i.bf16 %v346_v36, %v345_v28  ;;  %v1946_v42 = vpack.i.bf16 %v327_v37, %v326_v14  ;;  %v342_v44 = vsel %vm73_vm2, %v340_v38, %v341_v32 }
 0x1ef   :  { %v297_v24 = vpop.f32.mrb[7].mxu0  ;;  %v344_v0 = vsel %vm73_vm2, %v341_v32, %v343_v27  ;;  %v323_v45 = vsel %vm53_vm3, %v321_v39, %v322_v33  ;;  %v325_v34 = vsel %vm53_vm3, %v322_v33, %v324_v29  ;;  %v362_v57 = vsel %vm359_vm13, %v360_v51, %v361_v43 }
 0x1f0   :  { %v298_v46 = vadd.f32 %v297_v24, %v2365_v7  ;;  %1952 = vrot.lane.b32.xlu1 %v1951_v41, %s2162_s12  ;;  %1947 = vrot.lane.b32.xlu0 %v1946_v42, %s2160_s8  ;;  %v2411_v50 = vmax.f32 %v295_v40, 0.0  ;;  %v1961_v55 = vpack.i.bf16 %v344_v0, %v342_v44  ;;  %v1956_v56 = vpack.i.bf16 %v325_v34, %v323_v45 }
 0x1f1   :  { %v364_v58 = vsel %vm359_vm13, %v361_v43, %v363_v49  ;;  %v394_v48 = vsel %vm391_vm14, %v392_v52, %v393_v23  ;;  %v396_v47 = vsel %vm391_vm14, %v393_v23, %v395_v53  ;;  %v306_v63 = vadd.f32 %v1838_v35, %v2365_v7 }
 0x1f2   :  { %v2416_v54 = vmax.f32 %v298_v46, 0.0  ;;  %v451_v60 = vrot.slane %v2411_v50, 2  ;;  %v432_v61 = vrot.slane %v2411_v50, 1  ;;  %v1971_v1 = vpack.i.bf16 %v364_v58, %v362_v57 }
 0x1f3   :  { %v1966_v2 = vpack.i.bf16 %v396_v47, %v394_v48  ;;  %v470_v16 = vrot.slane %v2411_v50, 3  ;;  %v500_v18 = vrot.slane %v2411_v50, 5  ;;  %v2440_v27 = vmax.f32 %v306_v63, 0.0 }
 0x1f4   :  { %1962 = vrot.lane.b32.xlu1 %v1961_v55, %s2162_s12  ;;  %1957 = vrot.lane.b32.xlu0 %v1956_v56, %s2160_s8  ;;  %v452_v59 = vrot.slane %v2416_v54, 2  ;;  %v434_v62 = vrot.slane %v2416_v54, 1  ;;  %v471_v11 = vrot.slane %v2416_v54, 3  ;;  %v501_v12 = vrot.slane %v2416_v54, 5 }
 0x1f5   :  { %v433_v13 = vsel %vm53_vm3, %v326_v14, %v432_v61  ;;  %v397_v30 = vrot.slane %v2379_v22, 5  ;;  %v2447_v7 = vmax.f32 %v303_v9, 0.0  ;;  %v456_v32 = vrot.slane %v2440_v27, 2 }
 0x1f6   :  { %v453_v3 = vsel %vm73_vm2, %v451_v60, %v452_v59  ;;  %v435_v8 = vsel %vm53_vm3, %v432_v61, %v434_v62  ;;  %v472_v28 = vsel %vm359_vm13, %v470_v16, %v471_v11  ;;  %v502_v29 = vsel %vm391_vm14, %v500_v18, %v501_v12 }
 0x1f7   :  { %v1981_v19 = vpack.i.bf16 %v453_v3, %v451_v60  ;;  %v1976_v20 = vpack.i.bf16 %v435_v8, %v433_v13  ;;  %v1996_v14 = vpack.i.bf16 %v472_v28, %v470_v16  ;;  %v1986_v31 = vpack.i.bf16 %v502_v29, %v500_v18 }
 0x1f8   :  { %1972 = vrot.lane.b32.xlu1 %v1971_v1, %s2163_s13  ;;  %1967 = vrot.lane.b32.xlu0 %v1966_v2, %s2160_s8  ;;  %v366_v33 = vsel %vm359_vm13, %v363_v49, %v365_v25  ;;  %v398_v15 = vsel %vm391_vm14, %v395_v53, %v397_v30  ;;  %v454_v36 = vrot.slane %v2447_v7, 2  ;;  %v436_v37 = vrot.slane %v2447_v7, 1 }
 0x1f9   :  { %v475_v38 = vrot.slane %v2440_v27, 3  ;;  %v2001_v39 = vpack.i.bf16 %v366_v33, %v365_v25  ;;  %v1991_v40 = vpack.i.bf16 %v398_v15, %v397_v30  ;;  %v505_v35 = vrot.slane %v2440_v27, 5 }
 0x1fa   :  { %v455_v41 = vsel %vm73_vm2, %v452_v59, %v454_v36  ;;  %v457_v42 = vsel %vm73_vm2, %v454_v36, %v456_v32  ;;  %v437_v43 = vsel %vm53_vm3, %v434_v62, %v436_v37  ;;  %v473_v24 = vrot.slane %v2447_v7, 3 }
 0x1fb   :  { %v503_v44 = vrot.slane %v2447_v7, 5  ;;  %v2011_v0 = vpack.i.bf16 %v457_v42, %v455_v41  ;;  %v2006_v45 = vpack.i.bf16 %v436_v37, %v437_v43  ;;  %v381_v60 = vrot.slane %v2384_v26, 4 }
 0x1fc   :  { %1982 = vrot.lane.b32.xlu1 %v1981_v19, %s2162_s12  ;;  %1977 = vrot.lane.b32.xlu0 %v1976_v20, %s2160_s8  ;;  %v474_v23 = vsel %vm359_vm13, %v471_v11, %v473_v24  ;;  %v476_v46 = vsel %vm359_vm13, %v473_v24, %v475_v38  ;;  %v380_v2 = vrot.slane %v2377_v21, 4  ;;  %v383_v3 = vrot.slane %v2372_v17, 4 }
 0x1fd   :  { %v504_v34 = vsel %vm391_vm14, %v501_v12, %v503_v44  ;;  %v506_v49 = vsel %vm391_vm14, %v503_v44, %v505_v35  ;;  %v2021_v51 = vpack.i.bf16 %v476_v46, %v474_v23  ;;  %v385_v32 = vrot.slane %v2379_v22, 4 }
 0x1fe   :  { %v2016_v52 = vpack.i.bf16 %v506_v49, %v504_v34  ;;  %v382_v13 = vsel %vm379_vm15, %v380_v2, %v381_v60  ;;  %v489_v36 = vrot.slane %v2411_v50, 4 }
 0x200   :  { %1997 = vrot.lane.b32.xlu1 %v1996_v14, %s2163_s13  ;;  %1987 = vrot.lane.b32.xlu0 %v1986_v31, %s2160_s8  ;;  %v490_v31 = vrot.slane %v2416_v54, 4 }
 0x202   :  { %v491_v44 = vsel %vm379_vm15, %v489_v36, %v490_v31 }
 0x204   :  { %2002 = vrot.lane.b32.xlu1 %v2001_v39, %s2163_s13  ;;  %1992 = vrot.lane.b32.xlu0 %v1991_v40, %s2160_s8 }
 0x208   :  { %2012 = vrot.lane.b32.xlu1 %v2011_v0, %s2162_s12  ;;  %2007 = vrot.lane.b32.xlu0 %v2006_v45, %s2160_s8  ;;  %v386_v45 = vsel %vm379_vm15, %v383_v3, %v385_v32 }
 0x20c   :  { %2022 = vrot.lane.b32.xlu1 %v2021_v51, %s2163_s13  ;;  %2017 = vrot.lane.b32.xlu0 %v2016_v52, %s2160_s8 }
 0x262   :  { %v2473_v53 = vpop.permute.xlu1 %1952  ;;  %v1948_v55 = vpop.permute.xlu0 %1947 }
 0x263   :  { %v1950_v37 = vunpack.i.h.bf16 %v1948_v55  ;;  %v1949_v38 = vunpack.i.l.bf16 %v1948_v55  ;;  %v1955_v42 = vunpack.i.h.bf16 %v2473_v53  ;;  %v1954_v43 = vunpack.i.l.bf16 %v2473_v53 }
 0x265   :  { %v413_v49 = vsel %vm98_vm11, %v2372_v17, %v1950_v37  ;;  %v414_v51 = vsel %vm98_vm11, %v2379_v22, %v1949_v38  ;;  %v492_v37 = vrot.slane %v2447_v7, 4 }
 0x266   :  { %v1963_v56 = vpop.permute.xlu1 %1962  ;;  %v1958_v57 = vpop.permute.xlu0 %1957  ;;  %v419_v2 = vsel %vm415_vm0, %v414_v51, %v1954_v43 }
 0x267   :  { %v1960_v58 = vunpack.i.h.bf16 %v1958_v57  ;;  %v1959_v48 = vunpack.i.l.bf16 %v1958_v57  ;;  %v1965_v47 = vunpack.i.h.bf16 %v1963_v56  ;;  %v1964_v59 = vunpack.i.l.bf16 %v1963_v56 }
 0x269   :  { %v412_v61 = vsel %vm98_vm11, %v2384_v26, %v1960_v58  ;;  %v411_v62 = vsel %vm98_vm11, %v2377_v21, %v1959_v48  ;;  %v384_v26 = vsel %vm379_vm15, %v381_v60, %v383_v3 }
 0x26a   :  { %v1973_v63 = vpop.permute.xlu1 %1972  ;;  %v1968_v1 = vpop.permute.xlu0 %1967  ;;  %v416_v16 = vsel %vm415_vm0, %v411_v62, %v1964_v59  ;;  %v417_v18 = vsel %vm415_vm0, %v412_v61, %v1965_v47 }
 0x26b   :  { %v1975_v8 = vunpack.i.h.bf16 %v1973_v63  ;;  %v1974_v11 = vunpack.i.l.bf16 %v1973_v63  ;;  %v1970_v12 = vunpack.i.h.bf16 %v1968_v1  ;;  %v1969_v9 = vunpack.i.l.bf16 %v1968_v1 }
 0x26d   :  { %v425_v19 = vsel %vm98_vm11, %v382_v13, %v1969_v9  ;;  %v426_v21 = vsel %vm98_vm11, %v384_v26, %v1970_v12  ;;  %v421_v20 = vsel %vm420_vm1, %v416_v16, %v1974_v11  ;;  %v422_v25 = vsel %vm420_vm1, %v417_v18, %v1975_v8 }
 0x26e   :  { %v1983_v28 = vpop.permute.xlu1 %1982  ;;  %v1978_v29 = vpop.permute.xlu0 %1977  ;;  %v569_v30 = vpack.c.bf16 %v426_v21, %v425_v19  ;;  %v568_v14 = vpack.c.bf16 %v422_v25, %v421_v20  ;;  %v418_v8 = vsel %vm415_vm0, %v413_v49, %v1955_v42  ;;  %v494_v20 = vrot.slane %v2440_v27, 4 }
 0x26f   :  { %v1980_v33 = vunpack.i.h.bf16 %v1978_v29  ;;  %v1979_v15 = vunpack.i.l.bf16 %v1978_v29  ;;  %v1985_v39 = vunpack.i.h.bf16 %v1983_v28  ;;  %v1984_v40 = vunpack.i.l.bf16 %v1983_v28 }
 0x270   :  { %1723 = vmatprep.mubr.msk.bf16.mxu1 %vm415_vm0, %v569_v30  ;;  %v495_v42 = vsel %vm379_vm15, %v492_v37, %v494_v20 }
 0x271   :  { %v520_v35 = vsel %vm98_vm11, %v2411_v50, %v1980_v33  ;;  %v519_v41 = vsel %vm98_vm11, %v2379_v22, %v1979_v15  ;;  %721 = vmatmul.mubr.bf16.vlgmr.msra.gmra.mrb[0].mxu1 %v568_v14 }
 0x272   :  { %v1998_v24 = vpop.permute.xlu1 %1997  ;;  %v1988_v0 = vpop.permute.xlu0 %1987  ;;  %v523_v52 = vsel %vm415_vm0, %v519_v41, %v1984_v40  ;;  %v524_v53 = vsel %vm415_vm0, %v520_v35, %v1985_v39 }
 0x273   :  { %v2000_v23 = vunpack.i.h.bf16 %v1998_v24  ;;  %v1999_v46 = vunpack.i.l.bf16 %v1998_v24  ;;  %v1990_v50 = vunpack.i.h.bf16 %v1988_v0  ;;  %v1989_v34 = vunpack.i.l.bf16 %v1988_v0 }
 0x275   :  { %v527_v55 = vsel %vm420_vm1, %v523_v52, %v1999_v46  ;;  %v528_v56 = vsel %vm420_vm1, %v524_v53, %v2000_v23  ;;  %v532_v57 = vsel %vm98_vm11, %v491_v44, %v1990_v50  ;;  %v531_v58 = vsel %vm98_vm11, %v489_v36, %v1989_v34 }
 0x276   :  { %v543_v48 = vrot.slane %v527_v55, 5  ;;  %v544_v47 = vrot.slane %v528_v56, 5  ;;  %v547_v59 = vrot.slane %v532_v57, 5  ;;  %v546_v60 = vrot.slane %v531_v58, 5  ;;  %v2003_v17 = vpop.permute.xlu1 %2002  ;;  %v1993_v61 = vpop.permute.xlu0 %1992 }
 0x277   :  { %v2005_v62 = vunpack.i.h.bf16 %v2003_v17  ;;  %v2004_v22 = vunpack.i.l.bf16 %v2003_v17  ;;  %v1995_v63 = vunpack.i.h.bf16 %v1993_v61  ;;  %v1994_v1 = vunpack.i.l.bf16 %v1993_v61  ;;  %v2122_v17 = vld [vmem:[%s2892_s1 + $0x78] sm:$0xff]   ;;  %v2123_v61 = vld [vmem:[%s2892_s1 + $0xc0] sm:$0xff]  }
 0x278   :  { %v548_v3 = vsel %vm391_vm14, %v546_v60, %v547_v59  ;;  %v545_v11 = vsel %vm391_vm14, %v543_v48, %v544_v47  ;;  %v602_v57 = vsub.s32 1, %v2354_v4  ;;  %v2121_v60 = vld [vmem:[%s2892_s1 + $0xb8] sm:$0xff]  }
 0x279   :  { %v424_v12 = vsel %vm420_vm1, %v419_v2, %v2004_v22  ;;  %v427_v9 = vsel %vm98_vm11, %v386_v45, %v1995_v63  ;;  %v428_v13 = vsel %vm98_vm11, %v385_v32, %v1994_v1  ;;  %v423_v26 = vsel %vm420_vm1, %v418_v8, %v2005_v62  ;;  %1771 = vmatprep.subr.bf16.mxu0 %v2121_v60  ;;  %v2124_v1 = vld [vmem:[%s2892_s1 + $0x80] sm:$0xff]  }
 0x27a   :  { %v567_v16 = vsel %vm565_vm4, %v428_v13, %v548_v3  ;;  %v2013_v18 = vpop.permute.xlu1 %2012  ;;  %v2008_v19 = vpop.permute.xlu0 %2007  ;;  %v566_v21 = vsel %vm565_vm4, %v424_v12, %v545_v11  ;;  %v2549_v58 = vrot.slane %v2360_v6, %v602_v57  ;;  %1772 = vmatpush3.bf16.msra.mxu0 %v2122_v17 }
 0x27b   :  { %v571_v25 = vpack.c.bf16 %v567_v16, %v427_v9  ;;  %v2010_v28 = vunpack.i.h.bf16 %v2008_v19  ;;  %v2015_v29 = vunpack.i.h.bf16 %v2013_v18  ;;  %v2014_v30 = vunpack.i.l.bf16 %v2013_v18  ;;  %1773 = vmatprep.subr.bf16.mxu0 %v2123_v61  ;;  %v2125_v16 = vld [vmem:[%s2892_s1 + $0xc8] sm:$0xff]  }
 0x27c   :  { %v2009_v14 = vunpack.i.l.bf16 %v2008_v19  ;;  %v570_v33 = vpack.c.bf16 %v566_v21, %v423_v26  ;;  %v2126_v18 = vld [vmem:[%s2892_s1 + $0x88] sm:$0xff]   ;;  %v2127_v19 = vld [vmem:[%s2892_s1 + $0xd0] sm:$0xff]  }
 0x27d   :  { %v522_v15 = vsel %vm98_vm11, %v2447_v7, %v2010_v28  ;;  %1724 = vmatprep.mubr.msk.bf16.mxu1 %vm415_vm0, %v571_v25  ;;  %v493_v7 = vsel %vm379_vm15, %v490_v31, %v492_v37 }
 0x27e   :  { %v521_v32 = vsel %vm98_vm11, %v2416_v54, %v2009_v14  ;;  %v2023_v36 = vpop.permute.xlu1 %2022  ;;  %v2018_v38 = vpop.permute.xlu0 %2017  ;;  %729 = vmatmul.mubr.bf16.gmra.mrb[4].mxu1 %v570_v33  ;;  %v526_v41 = vsel %vm415_vm0, %v522_v15, %v2015_v29  ;;  %1774 = vmatpush3.bf16.msra.mxu0 %v2124_v1  ;;  %v2128_v29 = vld [vmem:[%s2892_s1 + $0x90] sm:$0xff]   ;;  %v2129_v33 = vld [vmem:[%s2892_s1 + $0xd8] sm:$0xff]  }
 0x27f   :  { %v2025_v27 = vunpack.i.h.bf16 %v2023_v36  ;;  %v2024_v39 = vunpack.i.l.bf16 %v2023_v36  ;;  %v2020_v40 = vunpack.i.h.bf16 %v2018_v38  ;;  %v525_v35 = vsel %vm415_vm0, %v521_v32, %v2014_v30  ;;  %1775 = vmatprep.subr.bf16.mxu0 %v2125_v16 }
 0x280   :  { %v2019_v43 = vunpack.i.l.bf16 %v2018_v38 }
 0x281   :  { %v529_v24 = vsel %vm420_vm1, %v525_v35, %v2024_v39  ;;  %v530_v44 = vsel %vm420_vm1, %v526_v41, %v2025_v27  ;;  %v534_v0 = vsel %vm98_vm11, %v495_v42, %v2020_v40  ;;  %v2130_v40 = vld [vmem:[%s2892_s1 + $0x98] sm:$0xff]  }
 0x282   :  { %v549_v45 = vrot.slane %v529_v24, 5  ;;  %v553_v23 = vrot.slane %v530_v44, 5  ;;  %v555_v46 = vrot.slane %v534_v0, 5  ;;  %v533_v50 = vsel %vm98_vm11, %v493_v7, %v2019_v43  ;;  %1776 = vmatpush3.bf16.msra.mxu0 %v2126_v18  ;;  %v2131_v24 = vld [vmem:[%s2892_s1 + $0xe0] sm:$0xff]  }
 0x283   :  { %v551_v34 = vrot.slane %v533_v50, 5  ;;  %1777 = vmatprep.subr.bf16.mxu0 %v2127_v19  ;;  %v2132_v44 = vld [vmem:[%s2892_s1 + $0xa0] sm:$0xff]  }
 0x284   :  { %v550_v49 = vsel %vm391_vm14, %v544_v47, %v549_v45  ;;  %v554_v51 = vsel %vm391_vm14, %v549_v45, %v553_v23  ;;  %v575_v31 = vpack.c.bf16 %v555_v46, %v555_v46  ;;  %v574_v56 = vpack.c.bf16 %v553_v23, %v553_v23 }
 0x285   :  { %v552_v52 = vsel %vm391_vm14, %v547_v59, %v551_v34  ;;  %v556_v53 = vsel %vm391_vm14, %v551_v34, %v555_v46  ;;  %v572_v55 = vpack.c.bf16 %v554_v51, %v550_v49 }
 0x286   :  { %v573_v54 = vpack.c.bf16 %v556_v53, %v552_v52  ;;  %1778 = vmatpush3.bf16.msra.mxu0 %v2128_v29 }
 0x287   :  { %1779 = vmatprep.subr.bf16.mxu0 %v2129_v33 }
 0x288   :  { %1725 = vmatprep.mubr.msk.bf16.mxu1 %vm415_vm0, %v573_v54  ;;  %v2133_v54 = vld [vmem:[%s2892_s1 + $0xe8] sm:$0xff]  }
 0x289   :  { %737 = vmatmul.mubr.bf16.gmra.mrb[8].mxu1 %v572_v55 }
 0x28a   :  { %1726 = vmatprep.mubr.msk.bf16.mxu1 %vm415_vm0, %v575_v31  ;;  %1780 = vmatpush3.bf16.msra.mxu0 %v2130_v40  ;;  %v2134_v31 = vld [vmem:[%s2892_s1 + $0xa8] sm:$0xff]  }
 0x28b   :  { %1781 = vmatprep.subr.bf16.mxu0 %v2131_v24 }
 0x28e   :  { %1782 = vmatpush3.bf16.msra.mxu0 %v2132_v44 }
 0x28f   :  { %1783 = vmatprep.subr.bf16.mxu0 %v2133_v54 }
 0x291   :  { %745 = vmatmul.mubr.bf16.gmra.mrb[12].mxu1 %v574_v56 }
 0x292   :  { %1784 = vmatpush3.bf16.msra.mxu0 %v2134_v31 }
 0x344   :  { %v722_v48 = vpop.f32.mrb[0].mxu1 }
 0x345   :  { %v723_v47 = vadd.f32 %v722_v48, %v2549_v58  ;;  %v724_v59 = vpop.f32.mrb[1].mxu1 }
 0x346   :  { %v725_v62 = vpop.f32.mrb[2].mxu1 }
 0x347   :  { %v2561_v22 = vmax.f32 %v723_v47, 0.0  ;;  %v726_v6 = vadd.f32 %v725_v62, %v2549_v58  ;;  %v727_v63 = vpop.f32.mrb[3].mxu1 }
 0x349   :  { %v2567_v2 = vmax.f32 %v726_v6, 0.0  ;;  %v761_v3 = vrot.slane %v2561_v22, 1  ;;  %v798_v11 = vrot.slane %v2561_v22, 5  ;;  %v770_v23 = vrot.slane %v2561_v22, 2 }
 0x34a   :  { %v810_v34 = vrot.slane %v2561_v22, 6  ;;  %v780_v33 = vrot.slane %v2561_v22, 3 }
 0x34b   :  { %v2571_v8 = vrot.slane %v2567_v2, 1  ;;  %v799_v12 = vrot.slane %v2567_v2, 5  ;;  %v811_v15 = vrot.slane %v2567_v2, 6  ;;  %v2601_v37 = vrot.slane %v2567_v2, 2 }
 0x34c   :  { %v781_v49 = vrot.slane %v2567_v2, 3  ;;  %v822_v29 = vrot.slane %v2567_v2, 7 }
 0x34d   :  { %v763_v9 = vsel %vm53_vm3, %v761_v3, %v2571_v8  ;;  %v800_v13 = vsel %vm391_vm14, %v798_v11, %v799_v12  ;;  %v772_v55 = vsel %vm73_vm2, %v770_v23, %v2601_v37  ;;  %v812_v61 = vsel %vm809_vm5, %v810_v34, %v811_v15 }
 0x34e   :  { %v2026_v26 = vpack.i.bf16 %v763_v9, %v800_v13 }
 0x350   :  { %2027 = vrot.lane.b32.xlu0 %v2026_v26, %s2160_s8 }
 0x351   :  { %v730_v21 = vpop.f32.mrb[4].mxu1 }
 0x352   :  { %v731_v20 = vadd.f32 %v730_v21, %v2549_v58  ;;  %v732_v25 = vpop.f32.mrb[5].mxu1 }
 0x353   :  { %v733_v28 = vpop.f32.mrb[6].mxu1  ;;  %v2136_v25 = vld [vmem:[%s2892_s1 + $0xb0] sm:$0xff]  }
 0x354   :  { %v2592_v30 = vmax.f32 %v731_v20, 0.0  ;;  %v735_v14 = vpop.f32.mrb[7].mxu1  ;;  %v734_v38 = vadd.f32 %v733_v28, %v2549_v58  ;;  %v2135_v20 = vld [vmem:[%s2892_s1 + $0xf0] sm:$0xff]  }
 0x355   :  { %1785 = vmatprep.subr.bf16.mxu0 %v2135_v20 }
 0x356   :  { %v813_v32 = vrot.slane %v2592_v30, 6  ;;  %v801_v36 = vrot.slane %v2592_v30, 5  ;;  %v2613_v42 = vmax.f32 %v734_v38, 0.0  ;;  %v783_v13 = vrot.slane %v2592_v30, 3  ;;  %1786 = vmatpush3.bf16.msra.mxu0 %v2136_v25 }
 0x357   :  { %v824_v21 = vrot.slane %v2592_v30, 7  ;;  %v821_v38 = vrot.slane %v2561_v22, 7  ;;  %v832_v31 = vrot.slane %v2592_v30, 1 }
 0x358   :  { %v814_v27 = vsel %vm809_vm5, %v811_v15, %v813_v32  ;;  %v802_v39 = vsel %vm391_vm14, %v799_v12, %v801_v36  ;;  %v883_v51 = vrot.slane %v2613_v42, 2  ;;  %v922_v52 = vrot.slane %v2613_v42, 6  ;;  %v2675_v15 = vld [vmem:[%s2892_s1 + $0xf8] sm:$0xff]  }
 0x359   :  { %v2036_v35 = vpack.i.bf16 %v2601_v37, %v814_v27  ;;  %v2031_v41 = vpack.i.bf16 %v2571_v8, %v802_v39  ;;  %v873_v53 = vrot.slane %v2613_v42, 1  ;;  %v911_v59 = vrot.slane %v2613_v42, 5  ;;  %1839 = vmatprep.subr.bf16.mxu0 %v2675_v15 }
 0x35a   :  { %v849_v1 = vrot.slane %v2613_v42, 3  ;;  %v2046_v36 = vpack.i.bf16 %v772_v55, %v812_v61  ;;  %v782_v27 = vsel %vm359_vm13, %v780_v33, %v781_v49  ;;  %v784_v39 = vsel %vm359_vm13, %v781_v49, %v783_v13 }
 0x35b   :  { %2037 = vrot.lane.b32.xlu1 %v2036_v35, %s2162_s12  ;;  %2032 = vrot.lane.b32.xlu0 %v2031_v41, %s2160_s8  ;;  %v825_v40 = vsel %vm565_vm4, %v822_v29, %v824_v21  ;;  %v833_v61 = vsel %vm53_vm3, %v2571_v8, %v832_v31 }
 0x35c   :  { %v738_v43 = vpop.f32.mrb[8].mxu1  ;;  %v850_v8 = vsel %vm359_vm13, %v783_v13, %v849_v1 }
 0x35d   :  { %v739_v7 = vadd.f32 %v738_v43, %v2549_v58  ;;  %v740_v0 = vpop.f32.mrb[9].mxu1  ;;  %v823_v43 = vsel %vm565_vm4, %v821_v38, %v822_v29 }
 0x35e   :  { %v741_v45 = vpop.f32.mrb[10].mxu1  ;;  %v2066_v0 = vpack.i.bf16 %v782_v27, %v823_v43 }
 0x35f   :  { %v2623_v46 = vmax.f32 %v739_v7, 0.0  ;;  %v743_v50 = vpop.f32.mrb[11].mxu1  ;;  %v742_v56 = vadd.f32 %v741_v45, %v2549_v58  ;;  %v2061_v7 = vpack.i.bf16 %v784_v39, %v825_v40 }
 0x361   :  { %v884_v57 = vrot.slane %v2623_v46, 2  ;;  %v923_v48 = vrot.slane %v2623_v46, 6  ;;  %v2642_v47 = vrot.slane %v2623_v46, 1  ;;  %v912_v60 = vrot.slane %v2623_v46, 5 }
 0x362   :  { %v894_v17 = vrot.slane %v2623_v46, 3  ;;  %v933_v9 = vrot.slane %v2623_v46, 7  ;;  %v2656_v26 = vmax.f32 %v742_v56, 0.0  ;;  %v905_v21 = vrot.slane %v2623_v46, 4 }
 0x363   :  { %v885_v62 = vsel %vm73_vm2, %v883_v51, %v884_v57  ;;  %v924_v6 = vsel %vm809_vm5, %v922_v52, %v923_v48  ;;  %v875_v63 = vsel %vm53_vm3, %v873_v53, %v2642_v47  ;;  %v913_v12 = vsel %vm391_vm14, %v911_v59, %v912_v60 }
 0x364   :  { %v746_v3 = vpop.f32.mrb[12].mxu1  ;;  %v2051_v11 = vpack.i.bf16 %v885_v62, %v924_v6  ;;  %v2041_v18 = vpack.i.bf16 %v875_v63, %v913_v12  ;;  %v895_v19 = vsel %vm359_vm13, %v849_v1, %v894_v17  ;;  %v914_v35 = vrot.slane %v2656_v26, 5 }
 0x365   :  { %v748_v16 = vpop.f32.mrb[13].mxu1  ;;  %v2056_v32 = vpack.i.bf16 %v895_v19, %v933_v9  ;;  %v747_v41 = vadd.f32 %v746_v3, %v2549_v58  ;;  %v886_v24 = vrot.slane %v2656_v26, 2  ;;  %v925_v44 = vrot.slane %v2656_v26, 6 }
 0x366   :  { %v749_v28 = vpop.f32.mrb[14].mxu1  ;;  %2052 = vrot.lane.b32.xlu1 %v2051_v11, %s2162_s12  ;;  %2042 = vrot.lane.b32.xlu0 %v2041_v18, %s2160_s8  ;;  %v915_v45 = vsel %vm391_vm14, %v912_v60, %v914_v35  ;;  %v896_v23 = vrot.slane %v2656_v26, 3  ;;  %v934_v50 = vrot.slane %v2656_v26, 7  ;;  %v942_v51 = vrot.slane %v2656_v26, 1 }
 0x367   :  { %v750_v14 = vpop.f32.mrb[15].mxu1  ;;  %v758_v34 = vmax.f32 %v747_v41, 0.0  ;;  %v887_v58 = vsel %vm73_vm2, %v884_v57, %v886_v24  ;;  %v926_v49 = vsel %vm809_vm5, %v923_v48, %v925_v44  ;;  %v2071_v52 = vpack.i.bf16 %v2642_v47, %v915_v45 }
 0x368   :  { %v2076_v53 = vpack.i.bf16 %v887_v58, %v926_v49  ;;  %v897_v55 = vsel %vm359_vm13, %v894_v17, %v896_v23  ;;  %v935_v54 = vsel %vm565_vm4, %v933_v9, %v934_v50  ;;  %v943_v57 = vsel %vm53_vm3, %v2642_v47, %v942_v51 }
 0x369   :  { %v951_v56 = vrot.slane %v758_v34, 2  ;;  %v2081_v48 = vpack.i.bf16 %v897_v55, %v935_v54  ;;  %v956_v59 = vrot.slane %v758_v34, 3  ;;  %v2091_v60 = vpack.i.bf16 %v942_v51, %v943_v57 }
 0x36a   :  { %2057 = vrot.lane.b32.xlu1 %v2056_v32, %s2163_s13  ;;  %2047 = vrot.lane.b32.xlu0 %v2046_v36, %s2162_s12  ;;  %v840_v62 = vrot.slane %v2592_v30, 2  ;;  %v2086_v6 = vpack.i.bf16 %v833_v61, %v832_v31  ;;  %v792_v18 = vrot.slane %v2567_v2, 4  ;;  %v794_v19 = vrot.slane %v2592_v30, 4 }
 0x36b   :  { %v952_v17 = vsel %vm73_vm2, %v886_v24, %v951_v56  ;;  %v957_v47 = vsel %vm359_vm13, %v896_v23, %v956_v59  ;;  %v791_v1 = vrot.slane %v2561_v22, 4  ;;  %v907_v31 = vrot.slane %v2656_v26, 4 }
 0x36c   :  { %v2096_v63 = vpack.i.bf16 %v840_v62, %v952_v17  ;;  %v2101_v3 = vpack.i.bf16 %v850_v8, %v957_v47  ;;  %v841_v11 = vsel %vm73_vm2, %v2601_v37, %v840_v62  ;;  %v904_v37 = vrot.slane %v2613_v42, 4 }
 0x36d   :  { %v793_v36 = vsel %vm379_vm15, %v791_v1, %v792_v18  ;;  %v795_v38 = vsel %vm379_vm15, %v792_v18, %v794_v19  ;;  %vm1621_vm3 = vcmp.lt.s32.totalorder %v2218_v10, 14 }
 0x36e   :  { %2062 = vrot.lane.b32.xlu1 %v2061_v7, %s2163_s13  ;;  %2067 = vrot.lane.b32.xlu0 %v2066_v0, %s2163_s13  ;;  %v906_v27 = vsel %vm379_vm15, %v904_v37, %v905_v21 }
 0x372   :  { %2072 = vrot.lane.b32.xlu1 %v2071_v52, %s2160_s8  ;;  %2077 = vrot.lane.b32.xlu0 %v2076_v53, %s2162_s12 }
 0x376   :  { %2082 = vrot.lane.b32.xlu1 %v2081_v48, %s2163_s13  ;;  %2092 = vrot.lane.b32.xlu0 %v2091_v60, %s2160_s8 }
 0x37a   :  { %2087 = vrot.lane.b32.xlu1 %v2086_v6, %s2160_s8  ;;  %2097 = vrot.lane.b32.xlu0 %v2096_v63, %s2162_s12 }
 0x37e   :  { %2102 = vrot.lane.b32.xlu1 %v2101_v3, %s2163_s13  ;;  %842 = vrot.lane.b32.xlu0 %v841_v11, %s2162_s12 }
 0x3c2   :  { %v2028_v12 = vpop.permute.xlu0 %2027 }
 0x3c3   :  { %v2030_v39 = vunpack.i.h.bf16 %v2028_v12  ;;  %v2029_v40 = vunpack.i.l.bf16 %v2028_v12 }
 0x3c5   :  { %v854_v53 = vsel %vm98_vm11, %v2561_v22, %v2030_v39  ;;  %v860_v55 = vsel %vm98_vm11, %v793_v36, %v2029_v40 }
 0x3cd   :  { %v2038_v9 = vpop.permute.xlu1 %2037  ;;  %v2033_v16 = vpop.permute.xlu0 %2032 }
 0x3ce   :  { %v2035_v13 = vunpack.i.h.bf16 %v2033_v16  ;;  %v2034_v25 = vunpack.i.l.bf16 %v2033_v16  ;;  %v2040_v24 = vunpack.i.h.bf16 %v2038_v9  ;;  %v2039_v44 = vunpack.i.l.bf16 %v2038_v9 }
 0x3d0   :  { %v855_v23 = vsel %vm98_vm11, %v2567_v2, %v2035_v13  ;;  %v861_v50 = vsel %vm98_vm11, %v795_v38, %v2034_v25 }
 0x3d1   :  { %v857_v57 = vsel %vm415_vm0, %v855_v23, %v2040_v24  ;;  %v863_v48 = vsel %vm415_vm0, %v861_v50, %v2039_v44 }
 0x3d8   :  { %v2053_v20 = vpop.permute.xlu1 %2052  ;;  %v2043_v28 = vpop.permute.xlu0 %2042 }
 0x3d9   :  { %v2055_v29 = vunpack.i.h.bf16 %v2053_v20  ;;  %v2054_v14 = vunpack.i.l.bf16 %v2053_v20  ;;  %v2045_v33 = vunpack.i.h.bf16 %v2043_v28  ;;  %v2044_v32 = vunpack.i.l.bf16 %v2043_v28 }
 0x3da   :  { %v908_v28 = vsel %vm379_vm15, %v905_v21, %v907_v31  ;;  %v2139_v21 = vld [vmem:[%s2892_s1 + $0x108] sm:$0xff]  }
 0x3db   :  { %v961_v35 = vsel %vm98_vm11, %v2613_v42, %v2045_v33  ;;  %v967_v41 = vsel %vm98_vm11, %v906_v27, %v2044_v32 }
 0x3dc   :  { %v2058_v43 = vpop.permute.xlu1 %2057  ;;  %v2048_v45 = vpop.permute.xlu0 %2047  ;;  %v963_v34 = vsel %vm415_vm0, %v961_v35, %v2055_v29  ;;  %v969_v58 = vsel %vm415_vm0, %v967_v41, %v2054_v14  ;;  %v2138_v29 = vld [vmem:[%s2892_s1 + $0x100] sm:$0xff]  }
 0x3dd   :  { %v2060_v7 = vunpack.i.h.bf16 %v2058_v43  ;;  %v2059_v0 = vunpack.i.l.bf16 %v2058_v43  ;;  %v2050_v51 = vunpack.i.h.bf16 %v2048_v45  ;;  %v2049_v52 = vunpack.i.l.bf16 %v2048_v45 }
 0x3df   :  { %v2742_v49 = vsel %vm420_vm1, %v963_v34, %v2060_v7  ;;  %v2745_v42 = vsel %vm420_vm1, %v969_v58, %v2059_v0  ;;  %v856_v6 = vsel %vm415_vm0, %v854_v53, %v2050_v51  ;;  %v862_v63 = vsel %vm415_vm0, %v860_v55, %v2049_v52 }
 0x3e0   :  { %v2750_v54 = vpop.permute.xlu1 %2062  ;;  %v2068_v56 = vpop.permute.xlu0 %2067  ;;  %v985_v61 = vrot.slane %v2742_v49, 3  ;;  %v986_v17 = vrot.slane %v2745_v42, 3  ;;  %v2140_v49 = vld [vmem:[%s2892_s1 + $0x110] sm:$0xff]  }
 0x3e1   :  { %v2065_v59 = vunpack.i.h.bf16 %v2750_v54  ;;  %v2064_v60 = vunpack.i.l.bf16 %v2750_v54  ;;  %v2070_v22 = vunpack.i.h.bf16 %v2068_v56  ;;  %v2069_v62 = vunpack.i.l.bf16 %v2068_v56  ;;  %v2143_v54 = vld [vmem:[%s2892_s1 + $0x128] sm:$0xff]  }
 0x3e3   :  { %v859_v47 = vsel %vm420_vm1, %v857_v57, %v2065_v59  ;;  %v865_v8 = vsel %vm420_vm1, %v863_v48, %v2064_v60  ;;  %v858_v3 = vsel %vm420_vm1, %v856_v6, %v2070_v22  ;;  %v864_v9 = vsel %vm420_vm1, %v862_v63, %v2069_v62  ;;  %v2142_v63 = vld [vmem:[%s2892_s1 + $0x120] sm:$0xff]  }
 0x3e4   :  { %v1003_v11 = vsel %vm73_vm2, %v859_v47, %v985_v61  ;;  %v2073_v12 = vpop.permute.xlu1 %2072  ;;  %v1004_v16 = vsel %vm73_vm2, %v865_v8, %v986_v17  ;;  %v2078_v19 = vpop.permute.xlu0 %2077 }
 0x3e5   :  { %v1006_v18 = vpack.c.bf16 %v1003_v11, %v858_v3  ;;  %v2075_v20 = vunpack.i.h.bf16 %v2073_v12  ;;  %v2074_v1 = vunpack.i.l.bf16 %v2073_v12  ;;  %v1007_v13 = vpack.c.bf16 %v1004_v16, %v864_v9  ;;  %v2144_v12 = vld [vmem:[%s2892_s1 + $0x130] sm:$0xff]  }
 0x3e6   :  { %v2080_v25 = vunpack.i.h.bf16 %v2078_v19  ;;  %v2079_v37 = vunpack.i.l.bf16 %v2078_v19  ;;  %v2146_v19 = vld [vmem:[%s2892_s1 + $0x140] sm:$0xff]  }
 0x3e7   :  { %v962_v14 = vsel %vm98_vm11, %v2623_v46, %v2075_v20  ;;  %v968_v33 = vsel %vm98_vm11, %v908_v28, %v2074_v1  ;;  %1240 = vmatprep.mubr.bf16.mxu0 %v1007_v13 }
 0x3e8   :  { %v2083_v32 = vpop.permute.xlu1 %2082  ;;  %1241 = vmatmul.mubr.bf16.vlgmr.msra.gmra.mrb[8].mxu0 %v1006_v18  ;;  %v2093_v36 = vpop.permute.xlu0 %2092  ;;  %v970_v40 = vsel %vm415_vm0, %v968_v33, %v2079_v37  ;;  %v964_v35 = vsel %vm415_vm0, %v962_v14, %v2080_v25  ;;  %v2145_v18 = vld [vmem:[%s2892_s1 + $0x138] sm:$0xff]  }
 0x3e9   :  { %v2085_v38 = vunpack.i.h.bf16 %v2083_v32  ;;  %v2084_v27 = vunpack.i.l.bf16 %v2083_v32  ;;  %1840 = vmatpush3.bf16.msra.mxu0 %v2675_v15  ;;  %v2094_v39 = vunpack.i.l.bf16 %v2093_v36  ;;  %v2095_v6 = vunpack.i.h.bf16 %v2093_v36  ;;  %1859 = vmatprep.subr.bf16.mxu1 %v2145_v18 }
 0x3ea   :  { %1841 = vmatprep.subr.bf16.mxu0 %v2138_v29  ;;  %1860 = vmatpush3.bf16.msra.mxu1 %v2145_v18 }
 0x3eb   :  { %v972_v41 = vsel %vm420_vm1, %v970_v40, %v2084_v27  ;;  %v966_v43 = vsel %vm420_vm1, %v964_v35, %v2085_v38  ;;  %v973_v24 = vsel %vm98_vm11, %v2623_v46, %v2094_v39  ;;  %v974_v3 = vsel %vm98_vm11, %v2656_v26, %v2095_v6  ;;  %1861 = vmatprep.subr.bf16.mxu1 %v2146_v19  ;;  %v2831_v39 = vld [vmem:[%s2893_s2] sm:$0xff] }
 0x3ec   :  { %v2088_v44 = vpop.permute.xlu1 %2087  ;;  %v990_v7 = vrot.slane %v972_v41, 3  ;;  %v988_v15 = vrot.slane %v966_v43, 3  ;;  %v975_v0 = vsel %vm415_vm0, %v973_v24, %v2080_v25  ;;  %v2098_v45 = vpop.permute.xlu0 %2097  ;;  %v1062_v27 = vsub.s32 2, %v2354_v4 }
 0x3ed   :  { %v2090_v23 = vunpack.i.h.bf16 %v2088_v44  ;;  %v2089_v50 = vunpack.i.l.bf16 %v2088_v44  ;;  %1842 = vmatpush3.bf16.msra.mxu0 %v2138_v29  ;;  %v2100_v34 = vunpack.i.h.bf16 %v2098_v45  ;;  %v977_v42 = vsel %vm420_vm1, %v975_v0, %v2085_v38 }
 0x3ee   :  { %1843 = vmatprep.subr.bf16.mxu0 %v2139_v21  ;;  %v991_v58 = vsel %vm359_vm13, %v986_v17, %v990_v7  ;;  %v989_v55 = vsel %vm359_vm13, %v985_v61, %v988_v15  ;;  %v987_v48 = vrot.slane %v977_v42, 3  ;;  %v2099_v47 = vunpack.i.l.bf16 %v2098_v45  ;;  %1862 = vmatpush3.bf16.msra.mxu1 %v2146_v19 }
 0x3ef   :  { %v867_v46 = vsel %vm98_vm11, %v2592_v30, %v2089_v50  ;;  %v866_v51 = vsel %vm98_vm11, %v2567_v2, %v2090_v23  ;;  %v1010_v52 = vpack.c.bf16 %v990_v7, %v991_v58  ;;  %v1009_v57 = vpack.c.bf16 %v988_v15, %v989_v55  ;;  %v2141_v30 = vld [vmem:[%s2892_s1 + $0x118] sm:$0xff]   ;;  %v1472_v55 = vld [vmem:[%s2894_s3] sm:$0xff] }
 0x3f0   :  { %v2103_v53 = vpop.permute.xlu1 %2102  ;;  %v843_v31 = vpop.permute.xlu0 %842  ;;  %v869_v17 = vsel %vm415_vm0, %v867_v46, %v2100_v34 }
 0x3f1   :  { %v2105_v56 = vunpack.i.h.bf16 %v2103_v53  ;;  %1844 = vmatpush3.bf16.msra.mxu0 %v2139_v21  ;;  %1248 = vmatprep.mubr.bf16.mxu0 %v1010_v52  ;;  %v868_v60 = vsel %vm415_vm0, %v866_v51, %v843_v31  ;;  %v2104_v8 = vunpack.i.l.bf16 %v2103_v53  ;;  %v1063_v21 = vrot.slane %v2831_v39, %v1062_v27  ;;  %v2147_v52 = vld [vmem:[%s2892_s1 + $0x148] sm:$0xff]   ;;  %v2148_v53 = vld [vmem:[%s2892_s1 + $0x150] sm:$0xff]  }
 0x3f2   :  { %1845 = vmatprep.subr.bf16.mxu0 %v2140_v49  ;;  %1249 = vmatmul.mubr.bf16.gmra.mrb[12].mxu0 %v1009_v57  ;;  %v870_v61 = vsel %vm420_vm1, %v868_v60, %v2065_v59  ;;  %v976_v59 = vsel %vm415_vm0, %v974_v3, %v2099_v47  ;;  %v1473_v31 = vld [vmem:[%s2894_s3 + $0x8] sm:$0xff]  ;;  %v1318_v57 = vsub.s32 3, %v2354_v4 }
 0x3f3   :  { %v871_v2 = vsel %vm420_vm1, %v869_v17, %v2105_v56  ;;  %v978_v11 = vsel %vm420_vm1, %v976_v59, %v2104_v8  ;;  %v1889_v56 = vpack.c.bf16 %v1473_v31, %v1472_v55 }
 0x3f4   :  { %v1005_v22 = vsel %vm73_vm2, %v871_v2, %v987_v48  ;;  %v992_v9 = vrot.slane %v978_v11, 3  ;;  %v1474_v11 = vld [vmem:[%s2894_s3 + $0x10] sm:$0xff] }
 0x3f5   :  { %1846 = vmatpush3.bf16.msra.mxu0 %v2140_v49  ;;  %v1008_v62 = vpack.c.bf16 %v1005_v22, %v870_v61  ;;  %1890 = vmatprep.subr.bf16.mxu1 %v1889_v56 }
 0x3f6   :  { %1847 = vmatprep.subr.bf16.mxu0 %v2141_v30  ;;  %v993_v26 = vsel %vm359_vm13, %v987_v48, %v992_v9  ;;  %v1319_v48 = vrot.slane %v2831_v39, %v1318_v57 }
 0x3f7   :  { %1855 = vmatprep.mubr.bf16.mxu0 %v1008_v62  ;;  %v1011_v16 = vpack.c.bf16 %v992_v9, %v993_v26  ;;  %v1399_v26 = vsub.s32 4, %v2354_v4 }
 0x3f9   :  { %1848 = vmatpush3.bf16.msra.mxu0 %v2141_v30 }
 0x3fa   :  { %1849 = vmatprep.subr.bf16.mxu0 %v2142_v63 }
 0x3fd   :  { %1850 = vmatpush3.bf16.msra.mxu0 %v2142_v63 }
 0x3fe   :  { %1851 = vmatprep.subr.bf16.mxu0 %v2143_v54 }
 0x401   :  { %1852 = vmatpush3.bf16.msra.mxu0 %v2143_v54 }
 0x402   :  { %1853 = vmatprep.subr.bf16.mxu0 %v2144_v12 }
 0x405   :  { %1854 = vmatpush3.bf16.msra.mxu0 %v2144_v12  ;;  %v1475_v12 = vld [vmem:[%s2894_s3 + $0x18] sm:$0xff]  ;;  %s2164_s3 = smov 112  }
 0x406   :  { %1867 = vmatprep.subr.bf16.mxu0 %v2147_v52  ;;  %v1893_v9 = vpack.c.bf16 %v1475_v12, %v1474_v11 }
 0x408   :  { %1856 = vmatmul.mubr.bf16.vlgmr.msra.gmra.mrb[16].mxu0 %v1011_v16  ;;  %v1400_v16 = vrot.slane %v2831_v39, %v1399_v26 }
 0x409   :  { %1868 = vmatpush3.bf16.msra.mxu0 %v2147_v52 }
 0x40a   :  { %1869 = vmatprep.subr.bf16.mxu0 %v2148_v53 }
 0x40d   :  { %1870 = vmatpush3.bf16.msra.mxu0 %v2148_v53 }
 0x4bb   :  { %v1787_v20 = vpop.f32.mrb[8].mxu0 }
 0x4bc   :  { %v1788_v1 = vpop.f32.mrb[9].mxu0 }
 0x4bd   :  { %v1789_v13 = vadd.f32 %v1788_v1, %v1787_v20  ;;  %v1790_v25 = vpop.f32.mrb[10].mxu0 }
 0x4be   :  { %v1791_v37 = vpop.f32.mrb[11].mxu0 }
 0x4bf   :  { %v1792_v28 = vadd.f32 %v1791_v37, %v1790_v25  ;;  %v1243_v41 = vadd.f32 %v1789_v13, %v1063_v21 }
 0x4c1   :  { %v1246_v0 = vadd.f32 %v1792_v28, %v1063_v21 }
 0x4c5   :  { %v1793_v29 = vpop.f32.mrb[12].mxu0 }
 0x4c6   :  { %v1794_v14 = vpop.f32.mrb[13].mxu0 }
 0x4c7   :  { %v1795_v33 = vadd.f32 %v1794_v14, %v1793_v29  ;;  %v1796_v32 = vpop.f32.mrb[14].mxu0 }
 0x4c8   :  { %v1797_v36 = vpop.f32.mrb[15].mxu0 }
 0x4c9   :  { %v1798_v38 = vadd.f32 %v1797_v36, %v1796_v32  ;;  %v1251_v40 = vadd.f32 %v1795_v33, %v1063_v21  ;;  %v1478_v36 = vsub.s32 5, %v2354_v4 }
 0x4cb   :  { %v1254_v44 = vadd.f32 %v1798_v38, %v1063_v21  ;;  %v1479_v38 = vrot.slane %v2831_v39, %v1478_v36 }
 0x4db   :  { %v1857_v35 = vpop.f32.mrb[16].mxu0 }
 0x4dc   :  { %v1300_v43 = vadd.f32 %v1857_v35, %v1251_v40  ;;  %v1291_v24 = vpop.f32.mrb[17].mxu0 }
 0x4dd   :  { %v1292_v7 = vadd.f32 %v1291_v24, %v1243_v41  ;;  %v1858_v15 = vpop.f32.mrb[18].mxu0 }
 0x4de   :  { %v1303_v45 = vadd.f32 %v1858_v15, %v1254_v44  ;;  %v1294_v23 = vpop.f32.mrb[19].mxu0  ;;  %v1308_v34 = vmax.f32 %v1300_v43, 0.0 }
 0x4df   :  { %v1295_v50 = vadd.f32 %v1294_v23, %v1246_v0  ;;  %v1306_v49 = vmax.f32 %v1292_v7, 0.0 }
 0x4e0   :  { %v1309_v58 = vmax.f32 %v1303_v45, 0.0 }
 0x4e1   :  { %v1307_v42 = vmax.f32 %v1295_v50, 0.0 }
 0x4e2   :  { %v1311_v46 = vpack.c.bf16 %v1309_v58, %v1308_v34 }
 0x4e3   :  { %v1310_v51 = vpack.c.bf16 %v1307_v42, %v1306_v49 }
 0x4e5   :  { %1863 = vmatprep.mubr.msk.bf16.mxu1 %vm98_vm11, %v1310_v51 }
 0x4e6   :  { %1864 = vmatmul.mubr.msk.bf16.vlgmr.msra.gmra.mrb[16].mxu1 %vm98_vm11, %v1311_v46 }
 0x4e7   :  { %1892 = vmatpush3.bf16.msra.mxu1 %v1889_v56 }
 0x4e8   :  { %1894 = vmatprep.subr.bf16.mxu1 %v1893_v9 }
 0x4eb   :  { %1896 = vmatpush3.bf16.msra.mxu1 %v1893_v9 }
 0x5b9   :  { %v1865_v60 = vpop.f32.mrb[16].mxu1 }
 0x5ba   :  { %v1381_v17 = vadd.f32 %v1865_v60, %v1319_v48  ;;  %v1372_v30 = vpop.f32.mrb[17].mxu1 }
 0x5bb   :  { %v1373_v2 = vadd.f32 %v1372_v30, %v1319_v48  ;;  %v1866_v61 = vpop.f32.mrb[18].mxu1 }
 0x5bc   :  { %v1384_v22 = vadd.f32 %v1866_v61, %v1319_v48  ;;  %v1375_v62 = vpop.f32.mrb[19].mxu1  ;;  %v1389_v63 = vmax.f32 %v1381_v17, 0.0 }
 0x5bd   :  { %v1376_v6 = vadd.f32 %v1375_v62, %v1319_v48  ;;  %v1387_v8 = vmax.f32 %v1373_v2, 0.0 }
 0x5be   :  { %v1390_v47 = vmax.f32 %v1384_v22, 0.0 }
 0x5bf   :  { %v1388_v3 = vmax.f32 %v1376_v6, 0.0 }
 0x5c0   :  { %v1392_v54 = vpack.c.bf16 %v1390_v47, %v1389_v63 }
 0x5c1   :  { %v1391_v59 = vpack.c.bf16 %v1388_v3, %v1387_v8 }
 0x5c3   :  { %1871 = vmatprep.mubr.msk.bf16.mxu0 %vm98_vm11, %v1391_v59 }
 0x5c4   :  { %1872 = vmatmul.mubr.msk.bf16.vlgmr.msra.gmra.mrb[20].mxu0 %vm98_vm11, %v1392_v54 }
 0x697   :  { %v1873_v18 = vpop.f32.mrb[20].mxu0 }
 0x698   :  { %v1453_v19 = vpop.f32.mrb[21].mxu0  ;;  %v1462_v13 = vadd.f32 %v1873_v18, %v1400_v16 }
 0x699   :  { %v1454_v20 = vadd.f32 %v1453_v19, %v1400_v16  ;;  %v1874_v1 = vpop.f32.mrb[22].mxu0 }
 0x69a   :  { %v1456_v25 = vpop.f32.mrb[23].mxu0  ;;  %v1465_v29 = vadd.f32 %v1874_v1, %v1400_v16  ;;  %v1470_v33 = vmax.f32 %v1462_v13, 0.0 }
 0x69b   :  { %v1468_v37 = vmax.f32 %v1454_v20, 0.0  ;;  %v1457_v28 = vadd.f32 %v1456_v25, %v1400_v16 }
 0x69c   :  { %v1471_v32 = vmax.f32 %v1465_v29, 0.0 }
 0x69d   :  { %v1469_v14 = vmax.f32 %v1457_v28, 0.0  ;;  %1883 = vmatprep.mubr.msk.f32.mxu1 %vm98_vm11, %v1468_v37 }
 0x69f   :  { %1884 = vmatmul.mubr.msk.f32.vlgmr.msra.gmra.mrb[20].mxu1 %vm98_vm11, %v1469_v14 }
 0x6a0   :  { %1886 = vmatprep.mubr.msk.f32.mxu1 %vm98_vm11, %v1470_v33 }
 0x6a3   :  { %1887 = vmatmul.mubr.msk.f32.gmra.mrb[22].mxu1 %vm98_vm11, %v1471_v32 }
 0x772   :  { %v1885_v27 = vpop.f32.mrb[20].mxu1 }
 0x773   :  { %v1558_v21 = vpop.f32.mrb[21].mxu1  ;;  %v1564_v35 = vadd.f32 %v1885_v27, %v1479_v38 }
 0x774   :  { %v1559_v40 = vadd.f32 %v1558_v21, %v1479_v38 }
 0x775   :  { %v1587_v7 = vsel %vm73_vm2, %v1564_v35, 0.0  ;;  %v1580_v0 = vrot.slane %v1564_v35, 6 }
 0x776   :  { %v1888_v41 = vpop.f32.mrb[22].mxu1  ;;  %1589 = vxpose.xlu1.b32.start [1/4] (short) (narrow) %v1559_v40, 8 }
 0x777   :  { %v1574_v43 = vadd.f32 %v1888_v41, %v1479_v38  ;;  %v1568_v24 = vpop.f32.mrb[23].mxu1 }
 0x778   :  { %v1569_v44 = vadd.f32 %v1568_v24, %v1479_v38 }
 0x779   :  { %v1583_v15 = vrot.slane %v1574_v43, 6 }
 0x77a   :  { %v1581_v45 = vrot.slane %v1569_v44, 6  ;;  %1590 = vxpose.xlu1.b32.cont [2/4] (short) (narrow) %v1587_v7, 8 }
 0x77c   :  { %v1582_v23 = vsel %vm809_vm5, %v1580_v0, %v1581_v45  ;;  %v1584_v50 = vsel %vm809_vm5, %v1581_v45, %v1583_v15 }
 0x77d   :  { %v1588_v39 = vsel %vm73_vm2, %v1584_v50, 0.0  ;;  %vm1640_vm2 = vcmask 125952  }
 0x77e   :  { %1591 = vxpose.xlu1.b32.cont [3/4] (short) (narrow) %v1582_v23, 8 }
 0x782   :  { %1592 = vxpose.xlu1.b32.end [4/4] (short) (narrow) %v1588_v39, 8 }
 0x7f6   :  { %v1605_v34 = vpop.trf.xlu1 }
 0x7f7   :  { %v1651_v58 = vrot.slane %v1605_v34, 4  ;;  %v1622_v49 = vsel %vm1621_vm3, %v1605_v34, -1e+30 }
 0x7f8   :  { %v1624_v42 = vsel %vm1623_vm6, %v1622_v49, -inf }
 0x7f9   :  { %1652 = vrot.lane.b32.xlu0 %v1651_v58, %s2164_s3 }
 0x818   :  { %1625 = vmax.xlane.f32.xlu0 %v1624_v42 }
 0x86b   :  { %v1653_v46 = vpop.permute.xlu0 %1652 }
 0x86c   :  { %v1655_v51 = vsel %vm1621_vm3, %v1653_v46, -1e+30 }
 0x86d   :  { %v1657_v52 = vsel %vm1656_vm7, %v1655_v51, -inf }
 0x86e   :  { %1658 = vmax.xlane.f32.xlu0 %v1657_v52 }
 0x8a5   :  { %v1626_v53 = vpop.xlane.xlu0 %1625 }
 0x8a6   :  { %v1627_v55 = vsub.f32 %v1622_v49, %v1626_v53 }
 0x8a8   :  { %v1628_v31 = vmul.f32 1.442695, %v1627_v55 }
 0x8aa   :  { %2149 = vpow2.f32 %v1628_v31 }
 0x8b4   :  { %v2150_v56 = vpop.eup %2149 }
 0x8b5   :  { %v1630_v57 = vsel %vm1623_vm6, %v2150_v56, 0.0 }
 0x8b6   :  { %1631 = vadd.xlane.f32.xlu0 %v1630_v57 }
 0x8fb   :  { %v1659_v48 = vpop.xlane.xlu0 %1658 }
 0x8fc   :  { %v1660_v60 = vsub.f32 %v1655_v51, %v1659_v48 }
 0x8fe   :  { %v1661_v10 = vmul.f32 1.442695, %v1660_v60 }
 0x900   :  { %2151 = vpow2.f32 %v1661_v10 }
 0x90a   :  { %v2152_v17 = vpop.eup %2151 }
 0x90b   :  { %v1663_v30 = vsel %vm1656_vm7, %v2152_v17, 0.0 }
 0x90c   :  { %1664 = vadd.xlane.f32.xlu0 %v1663_v30 }
 0x922   :  { %1672 = vrot.lane.b32.xlu0 %v1605_v34, %s2164_s3 }
 0x943   :  { %v1632_v2 = vpop.xlane.xlu0 %1631 }
 0x944   :  { %2153 = vrcp.f32 %v1632_v2 }
 0x94e   :  { %v2154_v61 = vpop.eup %2153 }
 0x94f   :  { %v1634_v22 = vmul.f32 %v2154_v61, %v2150_v56 }
 0x951   :  { %v1638_v62 = vrot.slane %v1634_v22, %v1399_v26 }
 0x953   :  { %v1639_v6 = vmul.f32 %v1638_v62, %v1605_v34 }
 0x955   :  { %v1641_v63 = vsel %vm1640_vm2, %v1639_v6, 0.0 }
 0x956   :  { %1642 = vadd.xlane.f32.xlu1 %v1641_v63 }
 0x999   :  { %v1665_v47 = vpop.xlane.xlu0 %1664 }
 0x99a   :  { %2155 = vrcp.f32 %v1665_v47 }
 0x99d   :  { %v1673_v59 = vpop.permute.xlu0 %1672 }
 0x9a4   :  { %v2156_v8 = vpop.eup %2155 }
 0x9a5   :  { %v1667_v3 = vmul.f32 %v2156_v8, %v2152_v17 }
 0x9a7   :  { %v1671_v54 = vrot.slane %v1667_v3, %v211_v5  ;;  %v1681_v20 = vrot.slane %v1667_v3, 4 }
 0x9a9   :  { %v1675_v11 = vmul.f32 %v1673_v59, %v1671_v54 }
 0x9ab   :  { %v1676_v12 = vsel %vm1640_vm2, %v1675_v11, 0.0 }
 0x9ac   :  { %1677 = vadd.xlane.f32.xlu0 %v1676_v12 }
 0x9e3   :  { %v1643_v9 = vpop.xlane.xlu1 %1642 }
 0x9e4   :  { %v1645_v16 = vsel %vm1644_vm8, %v1605_v34, %v1643_v9 }
 0x9e5   :  { %v1646_v26 = vsel %vm379_vm15, %v1645_v16, %v1634_v22 }
 0x9e6   :  { %v1647_v18 = vsel %vm359_vm13, %v1646_v26, 0.0 }
 0x9e7   :  { %v1648_v19 = vsel %vm93_vm10, %v1647_v18, 0.0 }
 0x9e8   :  { %1649 = vst [vmem:[%s2895_s4] sm:$0xff] %v1648_v19 }
 0xa39   :  { %v1678_v4 = vpop.xlane.xlu0 %1677 }
 0xa3a   :  { %v1679_v5 = vsel %vm1644_vm8, %v1673_v59, %v1678_v4 }
 0xa3b   :  { %v1683_v1 = vsel %vm379_vm15, %v1679_v5, %v1681_v20 }
 0xa3c   :  { %v1684_v13 = vsel %vm359_vm13, %v1683_v1, 0.0 }
 0xa3d   :  { %v1685_v25 = vsel %vm93_vm10, %v1684_v13, 0.0 }
 0xa3e   :  { %1763 = vst [vmem:[%s2895_s4 + $0x8] sm:$0xff] %v1685_v25 }

</bundles_post_ra>
